<compile_context>
chip_gen: v7x
topology: tpu7x:2x2x1
jax: 0.10.0
libtpu: 0.0.40
codegen_flags: <defaults>
</compile_context>

<pallas_src>
import functools
import math

import jax
import jax.numpy as jnp
from jax.experimental import pallas as pl
from jax.experimental.pallas import tpu as pltpu

# ------------------- configuration (shrunk dinov2_vits14-reg) ----------------
PATCH = 14
STRIDE = 14                     # default model_name -> stride == patch_size
IMG_SIZE = 28                   # -> 2x2 patch grid
GH = 1 + (IMG_SIZE - PATCH) // STRIDE
GW = 1 + (IMG_SIZE - PATCH) // STRIDE
NUM_PATCHES = GH * GW
EMBED_DIM = 32                  # shrunk from 384 (synthetic weights)
NUM_HEADS = 4
HEAD_DIM = EMBED_DIM // NUM_HEADS
MLP_HIDDEN = 4 * EMBED_DIM
NUM_REG = 4                     # register tokens of the "-reg" variant
LAYER = 9                       # hooked block index (facet='token')
NUM_BLOCKS = LAYER + 1
LN_EPS = 1e-6                   # DINOv2 LayerNorm eps
IMG_MEAN = (0.485, 0.456, 0.406)
IMG_STD = (0.229, 0.224, 0.225)


# ------------------------------ in-kernel helpers -----------------------------
def _layernorm(x, g, b):
    mu = jnp.mean(x, axis=-1, keepdims=True)
    xc = x - mu
    var = jnp.mean(xc * xc, axis=-1, keepdims=True)
    return xc * jax.lax.rsqrt(var + LN_EPS) * g + b


def _gelu_exact(x):
    # exact (erf) GELU, matching torch.nn.GELU default
    return 0.5 * x * (1.0 + jax.lax.erf(x * (1.0 / math.sqrt(2.0))))


# ------------------------------- Pallas kernels -------------------------------
def _patch_embed_kernel(p_ref, mean_ref, istd_ref, w_ref, b_ref, o_ref):
    # fused ImageNet normalization + patch-embedding projection (Conv2d with
    # kernel_size == stride == patch_size flattened to a matmul)
    p = (p_ref[...] - mean_ref[...]) * istd_ref[...]
    o_ref[...] = jnp.dot(p, w_ref[...], preferred_element_type=jnp.float32) + b_ref[...]


def _backbone_kernel(x0_ref,
                     ln1_g_ref, ln1_b_ref, qkv_w_ref, qkv_b_ref,
                     proj_w_ref, proj_b_ref, ls1_ref,
                     ln2_g_ref, ln2_b_ref, fc1_w_ref, fc1_b_ref,
                     fc2_w_ref, fc2_b_ref, ls2_ref,
                     norm_g_ref, norm_b_ref,
                     out_ref, *, batch, tokens):
    """One grid step == one transformer block; out_ref holds the residual
    stream (resident across the whole grid, written back to HBM once)."""
    l = pl.program_id(0)

    @pl.when(l == 0)
    def _():
        out_ref[...] = x0_ref[...]

    x = out_ref[...]                                           # (B*T, D)

    # ---- attention branch: LN1 -> QKV -> MHSA -> proj -> LayerScale+residual
    h = _layernorm(x, ln1_g_ref[...], ln1_b_ref[...])
    qkv = jnp.dot(h, qkv_w_ref[...],
                  preferred_element_type=jnp.float32) + qkv_b_ref[...]   # (B*T, 3D)

    scale = HEAD_DIM ** -0.5
    per_batch = []
    for b in range(batch):                                     # unrolled, B small
        rows = slice(b * tokens, (b + 1) * tokens)
        head_outs = []
        for hh in range(NUM_HEADS):                            # unrolled, H=4
            cq = slice(hh * HEAD_DIM, (hh + 1) * HEAD_DIM)
            ck = slice(EMBED_DIM + hh * HEAD_DIM, EMBED_DIM + (hh + 1) * HEAD_DIM)
            cv = slice(2 * EMBED_DIM + hh * HEAD_DIM, 2 * EMBED_DIM + (hh + 1) * HEAD_DIM)
            q = qkv[rows, cq] * scale                          # (T, dh)
            k = qkv[rows, ck]
            v = qkv[rows, cv]
            s = jax.lax.dot_general(q, k, (((1,), (1,)), ((), ())),
                                    preferred_element_type=jnp.float32)  # (T, T)
            s = s - jnp.max(s, axis=-1, keepdims=True)
            p = jnp.exp(s)
            p = p / jnp.sum(p, axis=-1, keepdims=True)
            head_outs.append(jnp.dot(p, v, preferred_element_type=jnp.float32))
        per_batch.append(jnp.concatenate(head_outs, axis=-1))  # (T, D)
    o = jnp.concatenate(per_batch, axis=0)                     # (B*T, D)
    o = jnp.dot(o, proj_w_ref[...],
                preferred_element_type=jnp.float32) + proj_b_ref[...]
    x = x + o * ls1_ref[...]                                   # LayerScale + residual

    # ---- MLP branch: LN2 -> fc1(GELU) -> fc2 -> LayerScale+residual
    h = _layernorm(x, ln2_g_ref[...], ln2_b_ref[...])
    h = jnp.dot(h, fc1_w_ref[...],
                preferred_element_type=jnp.float32) + fc1_b_ref[...]
    h = _gelu_exact(h)
    h = jnp.dot(h, fc2_w_ref[...],
                preferred_element_type=jnp.float32) + fc2_b_ref[...]
    x = x + h * ls2_ref[...]

    out_ref[...] = x

    # last block: fuse the final model.norm (per-token LN, so applying it to
    # the register tokens too is equivalent; they are dropped outside).
    @pl.when(l == pl.num_programs(0) - 1)
    def _():
        out_ref[...] = _layernorm(x, norm_g_ref[...], norm_b_ref[...])


# ------------------------------ kernel wrappers -------------------------------
def patch_embed(patches, mean_vec, istd_vec, w, b):
    M, _ = patches.shape
    N = w.shape[1]
    vmem = pl.BlockSpec(memory_space=pltpu.MemorySpace.VMEM)
    return pl.pallas_call(
        _patch_embed_kernel,
        out_shape=jax.ShapeDtypeStruct((M, N), jnp.float32),
        in_specs=[vmem, vmem, vmem, vmem, vmem],
        out_specs=vmem,
    )(patches, mean_vec, istd_vec, w, b)


def run_backbone(x0, params, *, batch, tokens):
    BT, D = x0.shape
    H = MLP_HIDDEN

    def vec_spec(last):
        return pl.BlockSpec((None, 1, last), lambda l: (l, 0, 0))

    def mat_spec(r, c):
        return pl.BlockSpec((None, r, c), lambda l: (l, 0, 0))

    full_spec = pl.BlockSpec((BT, D), lambda l: (0, 0))
    norm_spec = pl.BlockSpec((1, D), lambda l: (0, 0))

    kernel = functools.partial(_backbone_kernel, batch=batch, tokens=tokens)

    return pl.pallas_call(
        kernel,
        out_shape=jax.ShapeDtypeStruct((BT, D), jnp.float32),
        grid=(NUM_BLOCKS,),
        in_specs=[
            full_spec,                       # x0
            vec_spec(D), vec_spec(D),        # ln1_g, ln1_b
            mat_spec(D, 3 * D), vec_spec(3 * D),   # qkv_w, qkv_b
            mat_spec(D, D), vec_spec(D),     # proj_w, proj_b
            vec_spec(D),                     # ls1
            vec_spec(D), vec_spec(D),        # ln2_g, ln2_b
            mat_spec(D, H), vec_spec(H),     # fc1_w, fc1_b
            mat_spec(H, D), vec_spec(D),     # fc2_w, fc2_b
            vec_spec(D),                     # ls2
            norm_spec, norm_spec,            # final norm_g, norm_b
        ],
        out_specs=full_spec,
        compiler_params=pltpu.CompilerParams(dimension_semantics=("arbitrary",)),
    )(
        x0,
        params["ln1_g"], params["ln1_b"],
        params["qkv_w"], params["qkv_b"],
        params["proj_w"], params["proj_b"], params["ls1"],
        params["ln2_g"], params["ln2_b"],
        params["fc1_w"], params["fc1_b"],
        params["fc2_w"], params["fc2_b"], params["ls2"],
        params["norm_g"], params["norm_b"],
    )


# ------------------------------- forward glue ---------------------------------
def dino_forward(params, images):
    """Forward semantics of DinoFeatureExtractor.forward (facet='token')."""
    B, C, Himg, Wimg = images.shape
    gh = 1 + (Himg - PATCH) // STRIDE
    gw = 1 + (Wimg - PATCH) // STRIDE
    D = EMBED_DIM

    # TODO(synk): overlapping patch extraction for stride != patch_size is not
    # implemented (default model_name uses stride == patch_size == 14).
    patches = images.reshape(B, C, gh, PATCH, gw, PATCH)
    patches = patches.transpose(0, 2, 4, 1, 3, 5).reshape(B * gh * gw, C * PATCH * PATCH)

    tok = patch_embed(patches, params["mean_vec"], params["istd_vec"],
                      params["patch_w"], params["patch_b"])             # (B*np, D)
    tok = tok.reshape(B, gh * gw, D)

    cls = jnp.broadcast_to(params["cls_token"], (B, 1, D))
    x = jnp.concatenate([cls, tok], axis=1)
    # grid matches pos_embed -> interpolate_pos_encoding returns pos_embed as-is
    # TODO(synk): bicubic pos-embed interpolation (mismatched grids) not ported.
    x = x + params["pos_embed"]
    reg = jnp.broadcast_to(params["register_tokens"], (B, NUM_REG, D))
    x = jnp.concatenate([x[:, :1], reg, x[:, 1:]], axis=1)              # (B, T, D)
    T = x.shape[1]

    # Whole backbone (blocks 0..LAYER + final norm) in ONE pallas_call.
    toks = run_backbone(x.reshape(B * T, D), params, batch=B, tokens=T)
    toks = toks.reshape(B, T, D)

    cls_out = toks[:, 0, :]                                             # (B, D)
    patch_out = toks[:, 1 + NUM_REG:, :]                                # (B, np, D)

    # feature map: (B, D, gh, gw)  (matches reshape/permute in the torch module)
    fmap = patch_out.reshape(B, gh, gw, D).transpose(0, 3, 1, 2)
    return {"cls_tokens": cls_out, "feature_maps": fmap}


# ----------------------------- deterministic params ---------------------------
def init_params(key):
    L = NUM_BLOCKS
    D = EMBED_DIM
    K = 3 * PATCH * PATCH
    keys = jax.random.split(key, 32)        # plenty of keys (13 used)
    it = iter(keys)

    def nrm(shape, scale=0.02):
        return (scale * jax.random.normal(next(it), shape)).astype(jnp.float32)

    mean = jnp.asarray(IMG_MEAN, jnp.float32)
    std = jnp.asarray(IMG_STD, jnp.float32)
    params = {
        "mean_vec": jnp.repeat(mean, PATCH * PATCH).reshape(1, K),
        "istd_vec": jnp.repeat(1.0 / std, PATCH * PATCH).reshape(1, K),
        "patch_w": nrm((K, D)),
        "patch_b": nrm((1, D)),
        "cls_token": nrm((1, 1, D)),
        "register_tokens": nrm((1, NUM_REG, D)),
        "pos_embed": nrm((1, 1 + NUM_PATCHES, D)),
        "norm_g": jnp.ones((1, D), jnp.float32),
        "norm_b": jnp.zeros((1, D), jnp.float32),
        # per-layer block params, stacked along a leading L axis for the fused
        # single-pallas_call backbone (BlockSpec index_map picks layer l).
        "ln1_g": jnp.ones((L, 1, D), jnp.float32),
        "ln1_b": jnp.zeros((L, 1, D), jnp.float32),
        "qkv_w": nrm((L, D, 3 * D)),
        "qkv_b": nrm((L, 1, 3 * D)),
        "proj_w": nrm((L, D, D)),
        "proj_b": nrm((L, 1, D)),
        "ls1": jnp.full((L, 1, D), 0.1, jnp.float32),
        "ln2_g": jnp.ones((L, 1, D), jnp.float32),
        "ln2_b": jnp.zeros((L, 1, D), jnp.float32),
        "fc1_w": nrm((L, D, MLP_HIDDEN)),
        "fc1_b": nrm((L, 1, MLP_HIDDEN)),
        "fc2_w": nrm((L, MLP_HIDDEN, D)),
        "fc2_b": nrm((L, 1, D)),
        "ls2": jnp.full((L, 1, D), 0.1, jnp.float32),
    }
    return params


if __name__ == "__main__":
    key = jax.random.PRNGKey(0)
    pkey, xkey = jax.random.split(key)
    params = init_params(pkey)
    images = jax.random.uniform(xkey, (2, 3, IMG_SIZE, IMG_SIZE), dtype=jnp.float32)

    out = jax.jit(dino_forward)(params, images)
    out = jax.block_until_ready(out)

    assert out["cls_tokens"].shape == (2, EMBED_DIM)
    assert out["feature_maps"].shape == (2, EMBED_DIM, GH, GW)
    assert out["cls_tokens"].dtype == jnp.float32
    assert bool(jnp.all(jnp.isfinite(out["cls_tokens"])))
    assert bool(jnp.all(jnp.isfinite(out["feature_maps"])))
    print("KERNEL_OK")
</pallas_src>

<mosaic_0001>
module attributes {stable_mosaic.version = 11 : i64} {
  func.func @_patch_embed_kernel(%arg0: memref<8x588xf32, #tpu.memory_space<vmem>>, %arg1: memref<1x588xf32, #tpu.memory_space<vmem>>, %arg2: memref<1x588xf32, #tpu.memory_space<vmem>>, %arg3: memref<588x32xf32, #tpu.memory_space<vmem>>, %arg4: memref<1x32xf32, #tpu.memory_space<vmem>>, %arg5: memref<8x32xf32, #tpu.memory_space<vmem>>) attributes {dimension_semantics = [], scalar_prefetch = 0 : i64, scratch_operands = 0 : i64, tpu.core_type = #tpu.core_type<tc>} {
    %c0 = arith.constant 0 : index
    %c0_0 = arith.constant 0 : index
    %0 = vector.load %arg0[%c0, %c0_0] : memref<8x588xf32, #tpu.memory_space<vmem>>, vector<8x588xf32>
    %c0_1 = arith.constant 0 : index
    %c0_2 = arith.constant 0 : index
    %1 = vector.load %arg1[%c0_1, %c0_2] : memref<1x588xf32, #tpu.memory_space<vmem>>, vector<1x588xf32>
    %2 = vector.broadcast %1 : vector<1x588xf32> to vector<8x588xf32>
    %3 = arith.subf %0, %2 : vector<8x588xf32>
    %c0_3 = arith.constant 0 : index
    %c0_4 = arith.constant 0 : index
    %4 = vector.load %arg2[%c0_3, %c0_4] : memref<1x588xf32, #tpu.memory_space<vmem>>, vector<1x588xf32>
    %5 = vector.broadcast %4 : vector<1x588xf32> to vector<8x588xf32>
    %6 = arith.mulf %3, %5 : vector<8x588xf32>
    %c0_5 = arith.constant 0 : index
    %c0_6 = arith.constant 0 : index
    %7 = vector.load %arg3[%c0_5, %c0_6] : memref<588x32xf32, #tpu.memory_space<vmem>>, vector<588x32xf32>
    %cst = arith.constant dense<0.000000e+00> : vector<8x32xf32>
    %8 = tpu.matmul %6, %7, %cst {dimension_numbers = #tpu.dot_dimension_numbers<[1], [0], [0], [1], [0, 0, 1, 1], [], []>} : vector<8x588xf32>, vector<588x32xf32>, vector<8x32xf32> -> vector<8x32xf32>
    %c0_7 = arith.constant 0 : index
    %c0_8 = arith.constant 0 : index
    %9 = vector.load %arg4[%c0_7, %c0_8] : memref<1x32xf32, #tpu.memory_space<vmem>>, vector<1x32xf32>
    %10 = vector.broadcast %9 : vector<1x32xf32> to vector<8x32xf32>
    %11 = arith.addf %8, %10 : vector<8x32xf32>
    %c0_9 = arith.constant 0 : index
    %c0_10 = arith.constant 0 : index
    %12 = vector.load %arg5[%c0_9, %c0_10] : memref<8x32xf32, #tpu.memory_space<vmem>>, vector<8x32xf32>
    tpu.vector_store %arg5[%c0_9, %c0_10], %11 {strides = array<i32>} : memref<8x32xf32, #tpu.memory_space<vmem>>, vector<8x32xf32>,
    return
  }
}

module attributes {stable_mosaic.version = 11 : i64} {
  func.func @_backbone_kernel(%arg0: i32, %arg1: memref<18x32xf32, #tpu.memory_space<vmem>>, %arg2: memref<1x1x32xf32, #tpu.memory_space<vmem>>, %arg3: memref<1x1x32xf32, #tpu.memory_space<vmem>>, %arg4: memref<1x32x96xf32, #tpu.memory_space<vmem>>, %arg5: memref<1x1x96xf32, #tpu.memory_space<vmem>>, %arg6: memref<1x32x32xf32, #tpu.memory_space<vmem>>, %arg7: memref<1x1x32xf32, #tpu.memory_space<vmem>>, %arg8: memref<1x1x32xf32, #tpu.memory_space<vmem>>, %arg9: memref<1x1x32xf32, #tpu.memory_space<vmem>>, %arg10: memref<1x1x32xf32, #tpu.memory_space<vmem>>, %arg11: memref<1x32x128xf32, #tpu.memory_space<vmem>>, %arg12: memref<1x1x128xf32, #tpu.memory_space<vmem>>, %arg13: memref<1x128x32xf32, #tpu.memory_space<vmem>>, %arg14: memref<1x1x32xf32, #tpu.memory_space<vmem>>, %arg15: memref<1x1x32xf32, #tpu.memory_space<vmem>>, %arg16: memref<1x32xf32, #tpu.memory_space<vmem>>, %arg17: memref<1x32xf32, #tpu.memory_space<vmem>>, %arg18: memref<18x32xf32, #tpu.memory_space<vmem>>) attributes {dimension_semantics = [#tpu.dimension_semantics<arbitrary>], iteration_bounds = array<i64: 10>, scalar_prefetch = 0 : i64, scratch_operands = 0 : i64, tpu.core_type = #tpu.core_type<tc>, window_params = [{pipeline_mode = #tpu.pipeline_mode<synchronous>, transform_indices = @transform_0, window_bounds = array<i64: 18, 32>}, {transform_indices = @transform_1, window_bounds = array<i64: 1, 1, 32>}, {transform_indices = @transform_2, window_bounds = array<i64: 1, 1, 32>}, {transform_indices = @transform_3, window_bounds = array<i64: 1, 32, 96>}, {transform_indices = @transform_4, window_bounds = array<i64: 1, 1, 96>}, {transform_indices = @transform_5, window_bounds = array<i64: 1, 32, 32>}, {transform_indices = @transform_6, window_bounds = array<i64: 1, 1, 32>}, {transform_indices = @transform_7, window_bounds = array<i64: 1, 1, 32>}, {transform_indices = @transform_8, window_bounds = array<i64: 1, 1, 32>}, {transform_indices = @transform_9, window_bounds = array<i64: 1, 1, 32>}, {transform_indices = @transform_10, window_bounds = array<i64: 1, 32, 128>}, {transform_indices = @transform_11, window_bounds = array<i64: 1, 1, 128>}, {transform_indices = @transform_12, window_bounds = array<i64: 1, 128, 32>}, {transform_indices = @transform_13, window_bounds = array<i64: 1, 1, 32>}, {transform_indices = @transform_14, window_bounds = array<i64: 1, 1, 32>}, {pipeline_mode = #tpu.pipeline_mode<synchronous>, transform_indices = @transform_15, window_bounds = array<i64: 1, 32>}, {pipeline_mode = #tpu.pipeline_mode<synchronous>, transform_indices = @transform_16, window_bounds = array<i64: 1, 32>}, {pipeline_mode = #tpu.pipeline_mode<synchronous>, transform_indices = @transform_17, window_bounds = array<i64: 18, 32>}]} {
    %c0_i32 = arith.constant 0 : i32
    %0 = arith.cmpi eq, %arg0, %c0_i32 : i32
    %1 = arith.extui %0 : i1 to i32
    %c0_i32_0 = arith.constant 0 : i32
    %2 = arith.cmpi ne, %1, %c0_i32_0 : i32
    scf.if %2 {
      %c0_103 = arith.constant 0 : index
      %c0_104 = arith.constant 0 : index
      %233 = vector.load %arg1[%c0_103, %c0_104] : memref<18x32xf32, #tpu.memory_space<vmem>>, vector<18x32xf32>
      %c0_105 = arith.constant 0 : index
      %c0_106 = arith.constant 0 : index
      %234 = vector.load %arg18[%c0_105, %c0_106] : memref<18x32xf32, #tpu.memory_space<vmem>>, vector<18x32xf32>
      tpu.vector_store %arg18[%c0_105, %c0_106], %233 {strides = array<i32>} : memref<18x32xf32, #tpu.memory_space<vmem>>, vector<18x32xf32>,
    } else {
    }
    %c0 = arith.constant 0 : index
    %c0_1 = arith.constant 0 : index
    %3 = vector.load %arg18[%c0, %c0_1] : memref<18x32xf32, #tpu.memory_space<vmem>>, vector<18x32xf32>
    %c0_2 = arith.constant 0 : index
    %c0_3 = arith.constant 0 : index
    %c0_4 = arith.constant 0 : index
    %4 = vector.load %arg2[%c0_2, %c0_3, %c0_4] : memref<1x1x32xf32, #tpu.memory_space<vmem>>, vector<1x1x32xf32>
    %5 = vector.shape_cast %4 : vector<1x1x32xf32> to vector<1x32xf32>
    %c0_5 = arith.constant 0 : index
    %c0_6 = arith.constant 0 : index
    %c0_7 = arith.constant 0 : index
    %6 = vector.load %arg3[%c0_5, %c0_6, %c0_7] : memref<1x1x32xf32, #tpu.memory_space<vmem>>, vector<1x1x32xf32>
    %7 = vector.shape_cast %6 : vector<1x1x32xf32> to vector<1x32xf32>
    %cst = arith.constant dense<0.000000e+00> : vector<18xf32>
    %8 = vector.multi_reduction <add>, %3, %cst [1] : vector<18x32xf32> to vector<18xf32>
    %9 = vector.shape_cast %8 : vector<18xf32> to vector<18x1xf32>
    %cst_8 = arith.constant 3.200000e+01 : f32
    %10 = vector.broadcast %cst_8 : f32 to vector<18x1xf32>
    %11 = arith.divf %9, %10 : vector<18x1xf32>
    %12 = vector.broadcast %11 : vector<18x1xf32> to vector<18x32xf32>
    %13 = arith.subf %3, %12 : vector<18x32xf32>
    %14 = arith.mulf %13, %13 : vector<18x32xf32>
    %cst_9 = arith.constant dense<0.000000e+00> : vector<18xf32>
    %15 = vector.multi_reduction <add>, %14, %cst_9 [1] : vector<18x32xf32> to vector<18xf32>
    %16 = vector.shape_cast %15 : vector<18xf32> to vector<18x1xf32>
    %cst_10 = arith.constant 3.200000e+01 : f32
    %17 = vector.broadcast %cst_10 : f32 to vector<18x1xf32>
    %18 = arith.divf %16, %17 : vector<18x1xf32>
    %cst_11 = arith.constant 9.99999997E-7 : f32
    %19 = vector.broadcast %cst_11 : f32 to vector<18x1xf32>
    %20 = arith.addf %18, %19 : vector<18x1xf32>
    %21 = math.rsqrt %20 : vector<18x1xf32>
    %22 = vector.broadcast %21 : vector<18x1xf32> to vector<18x32xf32>
    %23 = arith.mulf %13, %22 : vector<18x32xf32>
    %24 = vector.broadcast %5 : vector<1x32xf32> to vector<18x32xf32>
    %25 = arith.mulf %23, %24 : vector<18x32xf32>
    %26 = vector.broadcast %7 : vector<1x32xf32> to vector<18x32xf32>
    %27 = arith.addf %25, %26 : vector<18x32xf32>
    %c0_12 = arith.constant 0 : index
    %c0_13 = arith.constant 0 : index
    %c0_14 = arith.constant 0 : index
    %28 = vector.load %arg4[%c0_12, %c0_13, %c0_14] : memref<1x32x96xf32, #tpu.memory_space<vmem>>, vector<1x32x96xf32>
    %29 = vector.shape_cast %28 : vector<1x32x96xf32> to vector<32x96xf32>
    %cst_15 = arith.constant dense<0.000000e+00> : vector<18x96xf32>
    %30 = tpu.matmul %27, %29, %cst_15 {dimension_numbers = #tpu.dot_dimension_numbers<[1], [0], [0], [1], [0, 0, 1, 1], [], []>} : vector<18x32xf32>, vector<32x96xf32>, vector<18x96xf32> -> vector<18x96xf32>
    %c0_16 = arith.constant 0 : index
    %c0_17 = arith.constant 0 : index
    %c0_18 = arith.constant 0 : index
    %31 = vector.load %arg5[%c0_16, %c0_17, %c0_18] : memref<1x1x96xf32, #tpu.memory_space<vmem>>, vector<1x1x96xf32>
    %32 = vector.shape_cast %31 : vector<1x1x96xf32> to vector<1x96xf32>
    %33 = vector.broadcast %32 : vector<1x96xf32> to vector<18x96xf32>
    %34 = arith.addf %30, %33 : vector<18x96xf32>
    %35 = vector.extract_strided_slice %34 {offsets = [0, 0], sizes = [9, 8], strides = [1, 1]} : vector<18x96xf32> to vector<9x8xf32>
    %cst_19 = arith.constant 0.353553385 : f32
    %36 = vector.broadcast %cst_19 : f32 to vector<9x8xf32>
    %37 = arith.mulf %35, %36 : vector<9x8xf32>
    %38 = vector.extract_strided_slice %34 {offsets = [0, 32], sizes = [9, 8], strides = [1, 1]} : vector<18x96xf32> to vector<9x8xf32>
    %39 = vector.extract_strided_slice %34 {offsets = [0, 64], sizes = [9, 8], strides = [1, 1]} : vector<18x96xf32> to vector<9x8xf32>
    %cst_20 = arith.constant dense<0.000000e+00> : vector<9x9xf32>
    %40 = tpu.matmul %37, %38, %cst_20 {dimension_numbers = #tpu.dot_dimension_numbers<[1], [1], [0], [0], [0, 0, 1, 0], [], []>} : vector<9x8xf32>, vector<9x8xf32>, vector<9x9xf32> -> vector<9x9xf32>
    %cst_21 = arith.constant dense<0xFF800000> : vector<9xf32>
    %41 = vector.multi_reduction <maximumf>, %40, %cst_21 [1] : vector<9x9xf32> to vector<9xf32>
    %42 = vector.shape_cast %41 : vector<9xf32> to vector<9x1xf32>
    %43 = vector.broadcast %42 : vector<9x1xf32> to vector<9x9xf32>
    %44 = arith.subf %40, %43 : vector<9x9xf32>
    %45 = math.exp %44 : vector<9x9xf32>
    %cst_22 = arith.constant dense<0.000000e+00> : vector<9xf32>
    %46 = vector.multi_reduction <add>, %45, %cst_22 [1] : vector<9x9xf32> to vector<9xf32>
    %47 = vector.shape_cast %46 : vector<9xf32> to vector<9x1xf32>
    %48 = vector.broadcast %47 : vector<9x1xf32> to vector<9x9xf32>
    %49 = arith.divf %45, %48 : vector<9x9xf32>
    %cst_23 = arith.constant dense<0.000000e+00> : vector<9x8xf32>
    %50 = tpu.matmul %49, %39, %cst_23 {dimension_numbers = #tpu.dot_dimension_numbers<[1], [0], [0], [1], [0, 0, 1, 1], [], []>} : vector<9x9xf32>, vector<9x8xf32>, vector<9x8xf32> -> vector<9x8xf32>
    %51 = vector.extract_strided_slice %34 {offsets = [0, 8], sizes = [9, 8], strides = [1, 1]} : vector<18x96xf32> to vector<9x8xf32>
    %cst_24 = arith.constant 0.353553385 : f32
    %52 = vector.broadcast %cst_24 : f32 to vector<9x8xf32>
    %53 = arith.mulf %51, %52 : vector<9x8xf32>
    %54 = vector.extract_strided_slice %34 {offsets = [0, 40], sizes = [9, 8], strides = [1, 1]} : vector<18x96xf32> to vector<9x8xf32>
    %55 = vector.extract_strided_slice %34 {offsets = [0, 72], sizes = [9, 8], strides = [1, 1]} : vector<18x96xf32> to vector<9x8xf32>
    %cst_25 = arith.constant dense<0.000000e+00> : vector<9x9xf32>
    %56 = tpu.matmul %53, %54, %cst_25 {dimension_numbers = #tpu.dot_dimension_numbers<[1], [1], [0], [0], [0, 0, 1, 0], [], []>} : vector<9x8xf32>, vector<9x8xf32>, vector<9x9xf32> -> vector<9x9xf32>
    %cst_26 = arith.constant dense<0xFF800000> : vector<9xf32>
    %57 = vector.multi_reduction <maximumf>, %56, %cst_26 [1] : vector<9x9xf32> to vector<9xf32>
    %58 = vector.shape_cast %57 : vector<9xf32> to vector<9x1xf32>
    %59 = vector.broadcast %58 : vector<9x1xf32> to vector<9x9xf32>
    %60 = arith.subf %56, %59 : vector<9x9xf32>
    %61 = math.exp %60 : vector<9x9xf32>
    %cst_27 = arith.constant dense<0.000000e+00> : vector<9xf32>
    %62 = vector.multi_reduction <add>, %61, %cst_27 [1] : vector<9x9xf32> to vector<9xf32>
    %63 = vector.shape_cast %62 : vector<9xf32> to vector<9x1xf32>
    %64 = vector.broadcast %63 : vector<9x1xf32> to vector<9x9xf32>
    %65 = arith.divf %61, %64 : vector<9x9xf32>
    %cst_28 = arith.constant dense<0.000000e+00> : vector<9x8xf32>
    %66 = tpu.matmul %65, %55, %cst_28 {dimension_numbers = #tpu.dot_dimension_numbers<[1], [0], [0], [1], [0, 0, 1, 1], [], []>} : vector<9x9xf32>, vector<9x8xf32>, vector<9x8xf32> -> vector<9x8xf32>
    %67 = vector.extract_strided_slice %34 {offsets = [0, 16], sizes = [9, 8], strides = [1, 1]} : vector<18x96xf32> to vector<9x8xf32>
    %cst_29 = arith.constant 0.353553385 : f32
    %68 = vector.broadcast %cst_29 : f32 to vector<9x8xf32>
    %69 = arith.mulf %67, %68 : vector<9x8xf32>
    %70 = vector.extract_strided_slice %34 {offsets = [0, 48], sizes = [9, 8], strides = [1, 1]} : vector<18x96xf32> to vector<9x8xf32>
    %71 = vector.extract_strided_slice %34 {offsets = [0, 80], sizes = [9, 8], strides = [1, 1]} : vector<18x96xf32> to vector<9x8xf32>
    %cst_30 = arith.constant dense<0.000000e+00> : vector<9x9xf32>
    %72 = tpu.matmul %69, %70, %cst_30 {dimension_numbers = #tpu.dot_dimension_numbers<[1], [1], [0], [0], [0, 0, 1, 0], [], []>} : vector<9x8xf32>, vector<9x8xf32>, vector<9x9xf32> -> vector<9x9xf32>
    %cst_31 = arith.constant dense<0xFF800000> : vector<9xf32>
    %73 = vector.multi_reduction <maximumf>, %72, %cst_31 [1] : vector<9x9xf32> to vector<9xf32>
    %74 = vector.shape_cast %73 : vector<9xf32> to vector<9x1xf32>
    %75 = vector.broadcast %74 : vector<9x1xf32> to vector<9x9xf32>
    %76 = arith.subf %72, %75 : vector<9x9xf32>
    %77 = math.exp %76 : vector<9x9xf32>
    %cst_32 = arith.constant dense<0.000000e+00> : vector<9xf32>
    %78 = vector.multi_reduction <add>, %77, %cst_32 [1] : vector<9x9xf32> to vector<9xf32>
    %79 = vector.shape_cast %78 : vector<9xf32> to vector<9x1xf32>
    %80 = vector.broadcast %79 : vector<9x1xf32> to vector<9x9xf32>
    %81 = arith.divf %77, %80 : vector<9x9xf32>
    %cst_33 = arith.constant dense<0.000000e+00> : vector<9x8xf32>
    %82 = tpu.matmul %81, %71, %cst_33 {dimension_numbers = #tpu.dot_dimension_numbers<[1], [0], [0], [1], [0, 0, 1, 1], [], []>} : vector<9x9xf32>, vector<9x8xf32>, vector<9x8xf32> -> vector<9x8xf32>
    %83 = vector.extract_strided_slice %34 {offsets = [0, 24], sizes = [9, 8], strides = [1, 1]} : vector<18x96xf32> to vector<9x8xf32>
    %cst_34 = arith.constant 0.353553385 : f32
    %84 = vector.broadcast %cst_34 : f32 to vector<9x8xf32>
    %85 = arith.mulf %83, %84 : vector<9x8xf32>
    %86 = vector.extract_strided_slice %34 {offsets = [0, 56], sizes = [9, 8], strides = [1, 1]} : vector<18x96xf32> to vector<9x8xf32>
    %87 = vector.extract_strided_slice %34 {offsets = [0, 88], sizes = [9, 8], strides = [1, 1]} : vector<18x96xf32> to vector<9x8xf32>
    %cst_35 = arith.constant dense<0.000000e+00> : vector<9x9xf32>
    %88 = tpu.matmul %85, %86, %cst_35 {dimension_numbers = #tpu.dot_dimension_numbers<[1], [1], [0], [0], [0, 0, 1, 0], [], []>} : vector<9x8xf32>, vector<9x8xf32>, vector<9x9xf32> -> vector<9x9xf32>
    %cst_36 = arith.constant dense<0xFF800000> : vector<9xf32>
    %89 = vector.multi_reduction <maximumf>, %88, %cst_36 [1] : vector<9x9xf32> to vector<9xf32>
    %90 = vector.shape_cast %89 : vector<9xf32> to vector<9x1xf32>
    %91 = vector.broadcast %90 : vector<9x1xf32> to vector<9x9xf32>
    %92 = arith.subf %88, %91 : vector<9x9xf32>
    %93 = math.exp %92 : vector<9x9xf32>
    %cst_37 = arith.constant dense<0.000000e+00> : vector<9xf32>
    %94 = vector.multi_reduction <add>, %93, %cst_37 [1] : vector<9x9xf32> to vector<9xf32>
    %95 = vector.shape_cast %94 : vector<9xf32> to vector<9x1xf32>
    %96 = vector.broadcast %95 : vector<9x1xf32> to vector<9x9xf32>
    %97 = arith.divf %93, %96 : vector<9x9xf32>
    %cst_38 = arith.constant dense<0.000000e+00> : vector<9x8xf32>
    %98 = tpu.matmul %97, %87, %cst_38 {dimension_numbers = #tpu.dot_dimension_numbers<[1], [0], [0], [1], [0, 0, 1, 1], [], []>} : vector<9x9xf32>, vector<9x8xf32>, vector<9x8xf32> -> vector<9x8xf32>
    %99 = tpu.concatenate %50, %66, %82, %98 in 1 : vector<9x8xf32>, vector<9x8xf32>, vector<9x8xf32>, vector<9x8xf32> -> vector<9x32xf32>
    %100 = vector.extract_strided_slice %34 {offsets = [9, 0], sizes = [9, 8], strides = [1, 1]} : vector<18x96xf32> to vector<9x8xf32>
    %cst_39 = arith.constant 0.353553385 : f32
    %101 = vector.broadcast %cst_39 : f32 to vector<9x8xf32>
    %102 = arith.mulf %100, %101 : vector<9x8xf32>
    %103 = vector.extract_strided_slice %34 {offsets = [9, 32], sizes = [9, 8], strides = [1, 1]} : vector<18x96xf32> to vector<9x8xf32>
    %104 = vector.extract_strided_slice %34 {offsets = [9, 64], sizes = [9, 8], strides = [1, 1]} : vector<18x96xf32> to vector<9x8xf32>
    %cst_40 = arith.constant dense<0.000000e+00> : vector<9x9xf32>
    %105 = tpu.matmul %102, %103, %cst_40 {dimension_numbers = #tpu.dot_dimension_numbers<[1], [1], [0], [0], [0, 0, 1, 0], [], []>} : vector<9x8xf32>, vector<9x8xf32>, vector<9x9xf32> -> vector<9x9xf32>
    %cst_41 = arith.constant dense<0xFF800000> : vector<9xf32>
    %106 = vector.multi_reduction <maximumf>, %105, %cst_41 [1] : vector<9x9xf32> to vector<9xf32>
    %107 = vector.shape_cast %106 : vector<9xf32> to vector<9x1xf32>
    %108 = vector.broadcast %107 : vector<9x1xf32> to vector<9x9xf32>
    %109 = arith.subf %105, %108 : vector<9x9xf32>
    %110 = math.exp %109 : vector<9x9xf32>
    %cst_42 = arith.constant dense<0.000000e+00> : vector<9xf32>
    %111 = vector.multi_reduction <add>, %110, %cst_42 [1] : vector<9x9xf32> to vector<9xf32>
    %112 = vector.shape_cast %111 : vector<9xf32> to vector<9x1xf32>
    %113 = vector.broadcast %112 : vector<9x1xf32> to vector<9x9xf32>
    %114 = arith.divf %110, %113 : vector<9x9xf32>
    %cst_43 = arith.constant dense<0.000000e+00> : vector<9x8xf32>
    %115 = tpu.matmul %114, %104, %cst_43 {dimension_numbers = #tpu.dot_dimension_numbers<[1], [0], [0], [1], [0, 0, 1, 1], [], []>} : vector<9x9xf32>, vector<9x8xf32>, vector<9x8xf32> -> vector<9x8xf32>
    %116 = vector.extract_strided_slice %34 {offsets = [9, 8], sizes = [9, 8], strides = [1, 1]} : vector<18x96xf32> to vector<9x8xf32>
    %cst_44 = arith.constant 0.353553385 : f32
    %117 = vector.broadcast %cst_44 : f32 to vector<9x8xf32>
    %118 = arith.mulf %116, %117 : vector<9x8xf32>
    %119 = vector.extract_strided_slice %34 {offsets = [9, 40], sizes = [9, 8], strides = [1, 1]} : vector<18x96xf32> to vector<9x8xf32>
    %120 = vector.extract_strided_slice %34 {offsets = [9, 72], sizes = [9, 8], strides = [1, 1]} : vector<18x96xf32> to vector<9x8xf32>
    %cst_45 = arith.constant dense<0.000000e+00> : vector<9x9xf32>
    %121 = tpu.matmul %118, %119, %cst_45 {dimension_numbers = #tpu.dot_dimension_numbers<[1], [1], [0], [0], [0, 0, 1, 0], [], []>} : vector<9x8xf32>, vector<9x8xf32>, vector<9x9xf32> -> vector<9x9xf32>
    %cst_46 = arith.constant dense<0xFF800000> : vector<9xf32>
    %122 = vector.multi_reduction <maximumf>, %121, %cst_46 [1] : vector<9x9xf32> to vector<9xf32>
    %123 = vector.shape_cast %122 : vector<9xf32> to vector<9x1xf32>
    %124 = vector.broadcast %123 : vector<9x1xf32> to vector<9x9xf32>
    %125 = arith.subf %121, %124 : vector<9x9xf32>
    %126 = math.exp %125 : vector<9x9xf32>
    %cst_47 = arith.constant dense<0.000000e+00> : vector<9xf32>
    %127 = vector.multi_reduction <add>, %126, %cst_47 [1] : vector<9x9xf32> to vector<9xf32>
    %128 = vector.shape_cast %127 : vector<9xf32> to vector<9x1xf32>
    %129 = vector.broadcast %128 : vector<9x1xf32> to vector<9x9xf32>
    %130 = arith.divf %126, %129 : vector<9x9xf32>
    %cst_48 = arith.constant dense<0.000000e+00> : vector<9x8xf32>
    %131 = tpu.matmul %130, %120, %cst_48 {dimension_numbers = #tpu.dot_dimension_numbers<[1], [0], [0], [1], [0, 0, 1, 1], [], []>} : vector<9x9xf32>, vector<9x8xf32>, vector<9x8xf32> -> vector<9x8xf32>
    %132 = vector.extract_strided_slice %34 {offsets = [9, 16], sizes = [9, 8], strides = [1, 1]} : vector<18x96xf32> to vector<9x8xf32>
    %cst_49 = arith.constant 0.353553385 : f32
    %133 = vector.broadcast %cst_49 : f32 to vector<9x8xf32>
    %134 = arith.mulf %132, %133 : vector<9x8xf32>
    %135 = vector.extract_strided_slice %34 {offsets = [9, 48], sizes = [9, 8], strides = [1, 1]} : vector<18x96xf32> to vector<9x8xf32>
    %136 = vector.extract_strided_slice %34 {offsets = [9, 80], sizes = [9, 8], strides = [1, 1]} : vector<18x96xf32> to vector<9x8xf32>
    %cst_50 = arith.constant dense<0.000000e+00> : vector<9x9xf32>
    %137 = tpu.matmul %134, %135, %cst_50 {dimension_numbers = #tpu.dot_dimension_numbers<[1], [1], [0], [0], [0, 0, 1, 0], [], []>} : vector<9x8xf32>, vector<9x8xf32>, vector<9x9xf32> -> vector<9x9xf32>
    %cst_51 = arith.constant dense<0xFF800000> : vector<9xf32>
    %138 = vector.multi_reduction <maximumf>, %137, %cst_51 [1] : vector<9x9xf32> to vector<9xf32>
    %139 = vector.shape_cast %138 : vector<9xf32> to vector<9x1xf32>
    %140 = vector.broadcast %139 : vector<9x1xf32> to vector<9x9xf32>
    %141 = arith.subf %137, %140 : vector<9x9xf32>
    %142 = math.exp %141 : vector<9x9xf32>
    %cst_52 = arith.constant dense<0.000000e+00> : vector<9xf32>
    %143 = vector.multi_reduction <add>, %142, %cst_52 [1] : vector<9x9xf32> to vector<9xf32>
    %144 = vector.shape_cast %143 : vector<9xf32> to vector<9x1xf32>
    %145 = vector.broadcast %144 : vector<9x1xf32> to vector<9x9xf32>
    %146 = arith.divf %142, %145 : vector<9x9xf32>
    %cst_53 = arith.constant dense<0.000000e+00> : vector<9x8xf32>
    %147 = tpu.matmul %146, %136, %cst_53 {dimension_numbers = #tpu.dot_dimension_numbers<[1], [0], [0], [1], [0, 0, 1, 1], [], []>} : vector<9x9xf32>, vector<9x8xf32>, vector<9x8xf32> -> vector<9x8xf32>
    %148 = vector.extract_strided_slice %34 {offsets = [9, 24], sizes = [9, 8], strides = [1, 1]} : vector<18x96xf32> to vector<9x8xf32>
    %cst_54 = arith.constant 0.353553385 : f32
    %149 = vector.broadcast %cst_54 : f32 to vector<9x8xf32>
    %150 = arith.mulf %148, %149 : vector<9x8xf32>
    %151 = vector.extract_strided_slice %34 {offsets = [9, 56], sizes = [9, 8], strides = [1, 1]} : vector<18x96xf32> to vector<9x8xf32>
    %152 = vector.extract_strided_slice %34 {offsets = [9, 88], sizes = [9, 8], strides = [1, 1]} : vector<18x96xf32> to vector<9x8xf32>
    %cst_55 = arith.constant dense<0.000000e+00> : vector<9x9xf32>
    %153 = tpu.matmul %150, %151, %cst_55 {dimension_numbers = #tpu.dot_dimension_numbers<[1], [1], [0], [0], [0, 0, 1, 0], [], []>} : vector<9x8xf32>, vector<9x8xf32>, vector<9x9xf32> -> vector<9x9xf32>
    %cst_56 = arith.constant dense<0xFF800000> : vector<9xf32>
    %154 = vector.multi_reduction <maximumf>, %153, %cst_56 [1] : vector<9x9xf32> to vector<9xf32>
    %155 = vector.shape_cast %154 : vector<9xf32> to vector<9x1xf32>
    %156 = vector.broadcast %155 : vector<9x1xf32> to vector<9x9xf32>
    %157 = arith.subf %153, %156 : vector<9x9xf32>
    %158 = math.exp %157 : vector<9x9xf32>
    %cst_57 = arith.constant dense<0.000000e+00> : vector<9xf32>
    %159 = vector.multi_reduction <add>, %158, %cst_57 [1] : vector<9x9xf32> to vector<9xf32>
    %160 = vector.shape_cast %159 : vector<9xf32> to vector<9x1xf32>
    %161 = vector.broadcast %160 : vector<9x1xf32> to vector<9x9xf32>
    %162 = arith.divf %158, %161 : vector<9x9xf32>
    %cst_58 = arith.constant dense<0.000000e+00> : vector<9x8xf32>
    %163 = tpu.matmul %162, %152, %cst_58 {dimension_numbers = #tpu.dot_dimension_numbers<[1], [0], [0], [1], [0, 0, 1, 1], [], []>} : vector<9x9xf32>, vector<9x8xf32>, vector<9x8xf32> -> vector<9x8xf32>
    %164 = tpu.concatenate %115, %131, %147, %163 in 1 : vector<9x8xf32>, vector<9x8xf32>, vector<9x8xf32>, vector<9x8xf32> -> vector<9x32xf32>
    %165 = tpu.concatenate %99, %164 in 0 : vector<9x32xf32>, vector<9x32xf32> -> vector<18x32xf32>
    %c0_59 = arith.constant 0 : index
    %c0_60 = arith.constant 0 : index
    %c0_61 = arith.constant 0 : index
    %166 = vector.load %arg6[%c0_59, %c0_60, %c0_61] : memref<1x32x32xf32, #tpu.memory_space<vmem>>, vector<1x32x32xf32>
    %167 = vector.shape_cast %166 : vector<1x32x32xf32> to vector<32x32xf32>
    %cst_62 = arith.constant dense<0.000000e+00> : vector<18x32xf32>
    %168 = tpu.matmul %165, %167, %cst_62 {dimension_numbers = #tpu.dot_dimension_numbers<[1], [0], [0], [1], [0, 0, 1, 1], [], []>} : vector<18x32xf32>, vector<32x32xf32>, vector<18x32xf32> -> vector<18x32xf32>
    %c0_63 = arith.constant 0 : index
    %c0_64 = arith.constant 0 : index
    %c0_65 = arith.constant 0 : index
    %169 = vector.load %arg7[%c0_63, %c0_64, %c0_65] : memref<1x1x32xf32, #tpu.memory_space<vmem>>, vector<1x1x32xf32>
    %170 = vector.shape_cast %169 : vector<1x1x32xf32> to vector<1x32xf32>
    %171 = vector.broadcast %170 : vector<1x32xf32> to vector<18x32xf32>
    %172 = arith.addf %168, %171 : vector<18x32xf32>
    %c0_66 = arith.constant 0 : index
    %c0_67 = arith.constant 0 : index
    %c0_68 = arith.constant 0 : index
    %173 = vector.load %arg8[%c0_66, %c0_67, %c0_68] : memref<1x1x32xf32, #tpu.memory_space<vmem>>, vector<1x1x32xf32>
    %174 = vector.shape_cast %173 : vector<1x1x32xf32> to vector<1x32xf32>
    %175 = vector.broadcast %174 : vector<1x32xf32> to vector<18x32xf32>
    %176 = arith.mulf %172, %175 : vector<18x32xf32>
    %177 = arith.addf %3, %176 : vector<18x32xf32>
    %c0_69 = arith.constant 0 : index
    %c0_70 = arith.constant 0 : index
    %c0_71 = arith.constant 0 : index
    %178 = vector.load %arg9[%c0_69, %c0_70, %c0_71] : memref<1x1x32xf32, #tpu.memory_space<vmem>>, vector<1x1x32xf32>
    %179 = vector.shape_cast %178 : vector<1x1x32xf32> to vector<1x32xf32>
    %c0_72 = arith.constant 0 : index
    %c0_73 = arith.constant 0 : index
    %c0_74 = arith.constant 0 : index
    %180 = vector.load %arg10[%c0_72, %c0_73, %c0_74] : memref<1x1x32xf32, #tpu.memory_space<vmem>>, vector<1x1x32xf32>
    %181 = vector.shape_cast %180 : vector<1x1x32xf32> to vector<1x32xf32>
    %cst_75 = arith.constant dense<0.000000e+00> : vector<18xf32>
    %182 = vector.multi_reduction <add>, %177, %cst_75 [1] : vector<18x32xf32> to vector<18xf32>
    %183 = vector.shape_cast %182 : vector<18xf32> to vector<18x1xf32>
    %cst_76 = arith.constant 3.200000e+01 : f32
    %184 = vector.broadcast %cst_76 : f32 to vector<18x1xf32>
    %185 = arith.divf %183, %184 : vector<18x1xf32>
    %186 = vector.broadcast %185 : vector<18x1xf32> to vector<18x32xf32>
    %187 = arith.subf %177, %186 : vector<18x32xf32>
    %188 = arith.mulf %187, %187 : vector<18x32xf32>
    %cst_77 = arith.constant dense<0.000000e+00> : vector<18xf32>
    %189 = vector.multi_reduction <add>, %188, %cst_77 [1] : vector<18x32xf32> to vector<18xf32>
    %190 = vector.shape_cast %189 : vector<18xf32> to vector<18x1xf32>
    %cst_78 = arith.constant 3.200000e+01 : f32
    %191 = vector.broadcast %cst_78 : f32 to vector<18x1xf32>
    %192 = arith.divf %190, %191 : vector<18x1xf32>
    %cst_79 = arith.constant 9.99999997E-7 : f32
    %193 = vector.broadcast %cst_79 : f32 to vector<18x1xf32>
    %194 = arith.addf %192, %193 : vector<18x1xf32>
    %195 = math.rsqrt %194 : vector<18x1xf32>
    %196 = vector.broadcast %195 : vector<18x1xf32> to vector<18x32xf32>
    %197 = arith.mulf %187, %196 : vector<18x32xf32>
    %198 = vector.broadcast %179 : vector<1x32xf32> to vector<18x32xf32>
    %199 = arith.mulf %197, %198 : vector<18x32xf32>
    %200 = vector.broadcast %181 : vector<1x32xf32> to vector<18x32xf32>
    %201 = arith.addf %199, %200 : vector<18x32xf32>
    %c0_80 = arith.constant 0 : index
    %c0_81 = arith.constant 0 : index
    %c0_82 = arith.constant 0 : index
    %202 = vector.load %arg11[%c0_80, %c0_81, %c0_82] : memref<1x32x128xf32, #tpu.memory_space<vmem>>, vector<1x32x128xf32>
    %203 = vector.shape_cast %202 : vector<1x32x128xf32> to vector<32x128xf32>
    %cst_83 = arith.constant dense<0.000000e+00> : vector<18x128xf32>
    %204 = tpu.matmul %201, %203, %cst_83 {dimension_numbers = #tpu.dot_dimension_numbers<[1], [0], [0], [1], [0, 0, 1, 1], [], []>} : vector<18x32xf32>, vector<32x128xf32>, vector<18x128xf32> -> vector<18x128xf32>
    %c0_84 = arith.constant 0 : index
    %c0_85 = arith.constant 0 : index
    %c0_86 = arith.constant 0 : index
    %205 = vector.load %arg12[%c0_84, %c0_85, %c0_86] : memref<1x1x128xf32, #tpu.memory_space<vmem>>, vector<1x1x128xf32>
    %206 = vector.shape_cast %205 : vector<1x1x128xf32> to vector<1x128xf32>
    %207 = vector.broadcast %206 : vector<1x128xf32> to vector<18x128xf32>
    %208 = arith.addf %204, %207 : vector<18x128xf32>
    %cst_87 = arith.constant 5.000000e-01 : f32
    %209 = vector.broadcast %cst_87 : f32 to vector<18x128xf32>
    %210 = arith.mulf %209, %208 : vector<18x128xf32>
    %cst_88 = arith.constant 0.707106769 : f32
    %211 = vector.broadcast %cst_88 : f32 to vector<18x128xf32>
    %212 = arith.mulf %208, %211 : vector<18x128xf32>
    %213 = math.erf %212 : vector<18x128xf32>
    %cst_89 = arith.constant 1.000000e+00 : f32
    %214 = vector.broadcast %cst_89 : f32 to vector<18x128xf32>
    %215 = arith.addf %214, %213 : vector<18x128xf32>
    %216 = arith.mulf %210, %215 : vector<18x128xf32>
    %c0_90 = arith.constant 0 : index
    %c0_91 = arith.constant 0 : index
    %c0_92 = arith.constant 0 : index
    %217 = vector.load %arg13[%c0_90, %c0_91, %c0_92] : memref<1x128x32xf32, #tpu.memory_space<vmem>>, vector<1x128x32xf32>
    %218 = vector.shape_cast %217 : vector<1x128x32xf32> to vector<128x32xf32>
    %cst_93 = arith.constant dense<0.000000e+00> : vector<18x32xf32>
    %219 = tpu.matmul %216, %218, %cst_93 {dimension_numbers = #tpu.dot_dimension_numbers<[1], [0], [0], [1], [0, 0, 1, 1], [], []>} : vector<18x128xf32>, vector<128x32xf32>, vector<18x32xf32> -> vector<18x32xf32>
    %c0_94 = arith.constant 0 : index
    %c0_95 = arith.constant 0 : index
    %c0_96 = arith.constant 0 : index
    %220 = vector.load %arg14[%c0_94, %c0_95, %c0_96] : memref<1x1x32xf32, #tpu.memory_space<vmem>>, vector<1x1x32xf32>
    %221 = vector.shape_cast %220 : vector<1x1x32xf32> to vector<1x32xf32>
    %222 = vector.broadcast %221 : vector<1x32xf32> to vector<18x32xf32>
    %223 = arith.addf %219, %222 : vector<18x32xf32>
    %c0_97 = arith.constant 0 : index
    %c0_98 = arith.constant 0 : index
    %c0_99 = arith.constant 0 : index
    %224 = vector.load %arg15[%c0_97, %c0_98, %c0_99] : memref<1x1x32xf32, #tpu.memory_space<vmem>>, vector<1x1x32xf32>
    %225 = vector.shape_cast %224 : vector<1x1x32xf32> to vector<1x32xf32>
    %226 = vector.broadcast %225 : vector<1x32xf32> to vector<18x32xf32>
    %227 = arith.mulf %223, %226 : vector<18x32xf32>
    %228 = arith.addf %177, %227 : vector<18x32xf32>
    %c0_100 = arith.constant 0 : index
    %c0_101 = arith.constant 0 : index
    %229 = vector.load %arg18[%c0_100, %c0_101] : memref<18x32xf32, #tpu.memory_space<vmem>>, vector<18x32xf32>
    tpu.vector_store %arg18[%c0_100, %c0_101], %228 {strides = array<i32>} : memref<18x32xf32, #tpu.memory_space<vmem>>, vector<18x32xf32>,
    %c9_i32 = arith.constant 9 : i32
    %230 = arith.cmpi eq, %arg0, %c9_i32 : i32
    %231 = arith.extui %230 : i1 to i32
    %c0_i32_102 = arith.constant 0 : i32
    %232 = arith.cmpi ne, %231, %c0_i32_102 : i32
    scf.if %232 {
      %c0_103 = arith.constant 0 : index
      %c0_104 = arith.constant 0 : index
      %233 = vector.load %arg16[%c0_103, %c0_104] : memref<1x32xf32, #tpu.memory_space<vmem>>, vector<1x32xf32>
      %c0_105 = arith.constant 0 : index
      %c0_106 = arith.constant 0 : index
      %234 = vector.load %arg17[%c0_105, %c0_106] : memref<1x32xf32, #tpu.memory_space<vmem>>, vector<1x32xf32>
      %cst_107 = arith.constant dense<0.000000e+00> : vector<18xf32>
      %235 = vector.multi_reduction <add>, %228, %cst_107 [1] : vector<18x32xf32> to vector<18xf32>
      %236 = vector.shape_cast %235 : vector<18xf32> to vector<18x1xf32>
      %cst_108 = arith.constant 3.200000e+01 : f32
      %237 = vector.broadcast %cst_108 : f32 to vector<18x1xf32>
      %238 = arith.divf %236, %237 : vector<18x1xf32>
      %239 = vector.broadcast %238 : vector<18x1xf32> to vector<18x32xf32>
      %240 = arith.subf %228, %239 : vector<18x32xf32>
      %241 = arith.mulf %240, %240 : vector<18x32xf32>
      %cst_109 = arith.constant dense<0.000000e+00> : vector<18xf32>
      %242 = vector.multi_reduction <add>, %241, %cst_109 [1] : vector<18x32xf32> to vector<18xf32>
      %243 = vector.shape_cast %242 : vector<18xf32> to vector<18x1xf32>
      %cst_110 = arith.constant 3.200000e+01 : f32
      %244 = vector.broadcast %cst_110 : f32 to vector<18x1xf32>
      %245 = arith.divf %243, %244 : vector<18x1xf32>
      %cst_111 = arith.constant 9.99999997E-7 : f32
      %246 = vector.broadcast %cst_111 : f32 to vector<18x1xf32>
      %247 = arith.addf %245, %246 : vector<18x1xf32>
      %248 = math.rsqrt %247 : vector<18x1xf32>
      %249 = vector.broadcast %248 : vector<18x1xf32> to vector<18x32xf32>
      %250 = arith.mulf %240, %249 : vector<18x32xf32>
      %251 = vector.broadcast %233 : vector<1x32xf32> to vector<18x32xf32>
      %252 = arith.mulf %250, %251 : vector<18x32xf32>
      %253 = vector.broadcast %234 : vector<1x32xf32> to vector<18x32xf32>
      %254 = arith.addf %252, %253 : vector<18x32xf32>
      %c0_112 = arith.constant 0 : index
      %c0_113 = arith.constant 0 : index
      %255 = vector.load %arg18[%c0_112, %c0_113] : memref<18x32xf32, #tpu.memory_space<vmem>>, vector<18x32xf32>
      tpu.vector_store %arg18[%c0_112, %c0_113], %254 {strides = array<i32>} : memref<18x32xf32, #tpu.memory_space<vmem>>, vector<18x32xf32>,
    } else {
    }
    return
  }
  func.func @transform_0(%arg0: i32) -> (i32, i32) {
    %c0_i32 = arith.constant 0 : i32
    %c0_i32_0 = arith.constant 0 : i32
    %c0_i32_1 = arith.constant 0 : i32
    return %c0_i32, %c0_i32_0 : i32, i32
  }
  func.func @transform_1(%arg0: i32) -> (i32, i32, i32) {
    %c0_i32 = arith.constant 0 : i32
    %c0_i32_0 = arith.constant 0 : i32
    %c0_i32_1 = arith.constant 0 : i32
    return %arg0, %c0_i32, %c0_i32_0 : i32, i32, i32
  }
  func.func @transform_2(%arg0: i32) -> (i32, i32, i32) {
    %c0_i32 = arith.constant 0 : i32
    %c0_i32_0 = arith.constant 0 : i32
    %c0_i32_1 = arith.constant 0 : i32
    return %arg0, %c0_i32, %c0_i32_0 : i32, i32, i32
  }
  func.func @transform_3(%arg0: i32) -> (i32, i32, i32) {
    %c0_i32 = arith.constant 0 : i32
    %c0_i32_0 = arith.constant 0 : i32
    %c0_i32_1 = arith.constant 0 : i32
    return %arg0, %c0_i32, %c0_i32_0 : i32, i32, i32
  }
  func.func @transform_4(%arg0: i32) -> (i32, i32, i32) {
    %c0_i32 = arith.constant 0 : i32
    %c0_i32_0 = arith.constant 0 : i32
    %c0_i32_1 = arith.constant 0 : i32
    return %arg0, %c0_i32, %c0_i32_0 : i32, i32, i32
  }
  func.func @transform_5(%arg0: i32) -> (i32, i32, i32) {
    %c0_i32 = arith.constant 0 : i32
    %c0_i32_0 = arith.constant 0 : i32
    %c0_i32_1 = arith.constant 0 : i32
    return %arg0, %c0_i32, %c0_i32_0 : i32, i32, i32
  }
  func.func @transform_6(%arg0: i32) -> (i32, i32, i32) {
    %c0_i32 = arith.constant 0 : i32
    %c0_i32_0 = arith.constant 0 : i32
    %c0_i32_1 = arith.constant 0 : i32
    return %arg0, %c0_i32, %c0_i32_0 : i32, i32, i32
  }
  func.func @transform_7(%arg0: i32) -> (i32, i32, i32) {
    %c0_i32 = arith.constant 0 : i32
    %c0_i32_0 = arith.constant 0 : i32
    %c0_i32_1 = arith.constant 0 : i32
    return %arg0, %c0_i32, %c0_i32_0 : i32, i32, i32
  }
  func.func @transform_8(%arg0: i32) -> (i32, i32, i32) {
    %c0_i32 = arith.constant 0 : i32
    %c0_i32_0 = arith.constant 0 : i32
    %c0_i32_1 = arith.constant 0 : i32
    return %arg0, %c0_i32, %c0_i32_0 : i32, i32, i32
  }
  func.func @transform_9(%arg0: i32) -> (i32, i32, i32) {
    %c0_i32 = arith.constant 0 : i32
    %c0_i32_0 = arith.constant 0 : i32
    %c0_i32_1 = arith.constant 0 : i32
    return %arg0, %c0_i32, %c0_i32_0 : i32, i32, i32
  }
  func.func @transform_10(%arg0: i32) -> (i32, i32, i32) {
    %c0_i32 = arith.constant 0 : i32
    %c0_i32_0 = arith.constant 0 : i32
    %c0_i32_1 = arith.constant 0 : i32
    return %arg0, %c0_i32, %c0_i32_0 : i32, i32, i32
  }
  func.func @transform_11(%arg0: i32) -> (i32, i32, i32) {
    %c0_i32 = arith.constant 0 : i32
    %c0_i32_0 = arith.constant 0 : i32
    %c0_i32_1 = arith.constant 0 : i32
    return %arg0, %c0_i32, %c0_i32_0 : i32, i32, i32
  }
  func.func @transform_12(%arg0: i32) -> (i32, i32, i32) {
    %c0_i32 = arith.constant 0 : i32
    %c0_i32_0 = arith.constant 0 : i32
    %c0_i32_1 = arith.constant 0 : i32
    return %arg0, %c0_i32, %c0_i32_0 : i32, i32, i32
  }
  func.func @transform_13(%arg0: i32) -> (i32, i32, i32) {
    %c0_i32 = arith.constant 0 : i32
    %c0_i32_0 = arith.constant 0 : i32
    %c0_i32_1 = arith.constant 0 : i32
    return %arg0, %c0_i32, %c0_i32_0 : i32, i32, i32
  }
  func.func @transform_14(%arg0: i32) -> (i32, i32, i32) {
    %c0_i32 = arith.constant 0 : i32
    %c0_i32_0 = arith.constant 0 : i32
    %c0_i32_1 = arith.constant 0 : i32
    return %arg0, %c0_i32, %c0_i32_0 : i32, i32, i32
  }
  func.func @transform_15(%arg0: i32) -> (i32, i32) {
    %c0_i32 = arith.constant 0 : i32
    %c0_i32_0 = arith.constant 0 : i32
    %c0_i32_1 = arith.constant 0 : i32
    return %c0_i32, %c0_i32_0 : i32, i32
  }
  func.func @transform_16(%arg0: i32) -> (i32, i32) {
    %c0_i32 = arith.constant 0 : i32
    %c0_i32_0 = arith.constant 0 : i32
    %c0_i32_1 = arith.constant 0 : i32
    return %c0_i32, %c0_i32_0 : i32, i32
  }
  func.func @transform_17(%arg0: i32) -> (i32, i32) {
    %c0_i32 = arith.constant 0 : i32
    %c0_i32_0 = arith.constant 0 : i32
    %c0_i32_1 = arith.constant 0 : i32
    return %c0_i32, %c0_i32_0 : i32, i32
  }
}

</mosaic_0001>

<bundles_post_ra>
// kernel: dino_forward.2
= control target key start
LH: loop header
LB: loop body
LE: loop exit
PB: predicated region body
PF: predicated region fallthrough
CT: control target
= control target key end

     0   :  { %v27_v47 = vlaneseq  ;;  %vm586_vm0 = vmmov 0   ;;  %vm174_vm1 = vcmask 1043456   ;;  %vm588_vm2 = vmmov 1   ;;  %s889_s3 = inlined_call_operand.vmem [shape: f32[588,32], index: 3, kind: input, shape index: {}]   ;;  %s890_s0 = inlined_call_operand.vmem [shape: f32[8,588], index: 0, kind: input, shape index: {}]   ;;  %s891_s1 = inlined_call_operand.vmem [shape: f32[1,588], index: 1, kind: input, shape index: {}]   ;;  %s892_s2 = inlined_call_operand.vmem [shape: f32[1,588], index: 2, kind: input, shape index: {}]   ;;  %s893_s4 = inlined_call_operand.vmem [shape: f32[1,32], index: 4, kind: input, shape index: {}]   ;;  %s894_s5 = inlined_call_operand.vmem [shape: f32[8,32], index: 5, kind: output, shape index: {}]  }
   0x1   :  { %v105_v0 = vld [vmem:[%s889_s3 + $0x80] sm:$0xff]  ;;  %v106_v1 = vld [vmem:[%s889_s3 + $0x88] sm:$0xff]  ;;  %v107_v11 = vld [vmem:[%s889_s3 + $0x90] sm:$0xff]  ;;  %vm170_vm4 = vcmask 621568   ;;  %vm388_vm5 = vcmask 261120  }
   0x2   :  { %v89_v2 = vld [vmem:[%s889_s3] sm:$0xff]  ;;  %v501_v3 = vpack.c.bf16 %v106_v1, %v105_v0  ;;  %v90_v4 = vld [vmem:[%s889_s3 + $0x8] sm:$0xff]  ;;  %v108_v13 = vld [vmem:[%s889_s3 + $0x98] sm:$0xff]  ;;  %v745_v61 = vshrl.u32 %v27_v47, 7 }
   0x3   :  { %v137_v5 = vld [vmem:[%s889_s3 + $0x180] sm:$0xff]  ;;  %v138_v6 = vld [vmem:[%s889_s3 + $0x188] sm:$0xff]  ;;  %v503_v7 = vpack.c.bf16 %v90_v4, %v89_v2  ;;  %v91_v14 = vld [vmem:[%s889_s3 + $0x10] sm:$0xff]  ;;  %v505_v16 = vpack.c.bf16 %v108_v13, %v107_v11 }
   0x4   :  { %v533_v8 = vpack.c.bf16 %v138_v6, %v137_v5  ;;  %v121_v9 = vld [vmem:[%s889_s3 + $0x100] sm:$0xff]  ;;  %v122_v10 = vld [vmem:[%s889_s3 + $0x108] sm:$0xff]  ;;  %502 = vmatprep.subr.bf16.mxu0 %v501_v3  ;;  %v92_v15 = vld [vmem:[%s889_s3 + $0x18] sm:$0xff] }
   0x5   :  { %v535_v12 = vpack.c.bf16 %v122_v10, %v121_v9  ;;  %504 = vmatpush3.bf16.msra.mxu0 %v503_v7  ;;  %v507_v17 = vpack.c.bf16 %v92_v15, %v91_v14  ;;  %v139_v18 = vld [vmem:[%s889_s3 + $0x190] sm:$0xff]  ;;  %v140_v19 = vld [vmem:[%s889_s3 + $0x198] sm:$0xff]  ;;  %v109_v23 = vld [vmem:[%s889_s3 + $0xa0] sm:$0xff]  ;;  %v33_v10 = vsub.s32 1, %v745_v61  ;;  %v29_v14 = vsub.s32 0, %v745_v61 }
   0x6   :  { %534 = vmatprep.subr.bf16.mxu1 %v533_v8  ;;  %v123_v20 = vld [vmem:[%s889_s3 + $0x110] sm:$0xff]  ;;  %v537_v21 = vpack.c.bf16 %v140_v19, %v139_v18  ;;  %v124_v22 = vld [vmem:[%s889_s3 + $0x118] sm:$0xff]  ;;  %v110_v24 = vld [vmem:[%s889_s3 + $0xa8] sm:$0xff]  ;;  %506 = vmatprep.subr.bf16.mxu0 %v505_v16  ;;  %v41_v15 = vsub.s32 3, %v745_v61 }
   0x7   :  { %536 = vmatpush3.bf16.msra.mxu1 %v535_v12  ;;  %v539_v25 = vpack.c.bf16 %v124_v22, %v123_v20  ;;  %v509_v26 = vpack.c.bf16 %v110_v24, %v109_v23  ;;  %v93_v27 = vld [vmem:[%s889_s3 + $0x20] sm:$0xff]  ;;  %v94_v28 = vld [vmem:[%s889_s3 + $0x28] sm:$0xff]  ;;  %v111_v35 = vld [vmem:[%s889_s3 + $0xb0] sm:$0xff]  ;;  %v37_v20 = vsub.s32 2, %v745_v61 }
   0x8   :  { %v141_v29 = vld [vmem:[%s889_s3 + $0x1a0] sm:$0xff]  ;;  %538 = vmatprep.subr.bf16.mxu1 %v537_v21  ;;  %v142_v30 = vld [vmem:[%s889_s3 + $0x1a8] sm:$0xff]  ;;  %v511_v33 = vpack.c.bf16 %v94_v28, %v93_v27  ;;  %v112_v36 = vld [vmem:[%s889_s3 + $0xb8] sm:$0xff] }
   0x9   :  { %v125_v31 = vld [vmem:[%s889_s3 + $0x120] sm:$0xff]  ;;  %v126_v32 = vld [vmem:[%s889_s3 + $0x128] sm:$0xff]  ;;  %508 = vmatpush3.bf16.msra.mxu0 %v507_v17  ;;  %v541_v34 = vpack.c.bf16 %v142_v30, %v141_v29  ;;  %v95_v37 = vld [vmem:[%s889_s3 + $0x30] sm:$0xff]  ;;  %v513_v39 = vpack.c.bf16 %v112_v36, %v111_v35 }
   0xa   :  { %510 = vmatprep.subr.bf16.mxu0 %v509_v26  ;;  %v543_v38 = vpack.c.bf16 %v126_v32, %v125_v31  ;;  %v96_v40 = vld [vmem:[%s889_s3 + $0x38] sm:$0xff]  ;;  %v143_v41 = vld [vmem:[%s889_s3 + $0x1b0] sm:$0xff]  ;;  %v113_v46 = vld [vmem:[%s889_s3 + $0xc0] sm:$0xff] }
   0xb   :  { %540 = vmatpush3.bf16.msra.mxu1 %v539_v25  ;;  %v144_v42 = vld [vmem:[%s889_s3 + $0x1b8] sm:$0xff]  ;;  %v127_v44 = vld [vmem:[%s889_s3 + $0x130] sm:$0xff]  ;;  %v114_v48 = vld [vmem:[%s889_s3 + $0xc8] sm:$0xff]  ;;  %v515_v49 = vpack.c.bf16 %v96_v40, %v95_v37 }
   0xc   :  { %542 = vmatprep.subr.bf16.mxu1 %v541_v34  ;;  %v545_v43 = vpack.c.bf16 %v144_v42, %v143_v41  ;;  %v128_v45 = vld [vmem:[%s889_s3 + $0x138] sm:$0xff]  ;;  %v145_v50 = vld [vmem:[%s889_s3 + $0x1c0] sm:$0xff]  ;;  %v146_v51 = vld [vmem:[%s889_s3 + $0x1c8] sm:$0xff]  ;;  %v517_v53 = vpack.c.bf16 %v114_v48, %v113_v46 }
   0xd   :  { %512 = vmatpush3.bf16.msra.mxu0 %v511_v33  ;;  %v547_v52 = vpack.c.bf16 %v128_v45, %v127_v44  ;;  %v97_v54 = vld [vmem:[%s889_s3 + $0x40] sm:$0xff]  ;;  %v98_v55 = vld [vmem:[%s889_s3 + $0x48] sm:$0xff]  ;;  %v549_v57 = vpack.c.bf16 %v146_v51, %v145_v50  ;;  %v115_v59 = vld [vmem:[%s889_s3 + $0xd0] sm:$0xff] }
   0xe   :  { %514 = vmatprep.subr.bf16.mxu0 %v513_v39  ;;  %v129_v56 = vld [vmem:[%s889_s3 + $0x140] sm:$0xff]  ;;  %v130_v58 = vld [vmem:[%s889_s3 + $0x148] sm:$0xff]  ;;  %v116_v60 = vld [vmem:[%s889_s3 + $0xd8] sm:$0xff]  ;;  %v519_v0 = vpack.c.bf16 %v98_v55, %v97_v54 }
   0xf   :  { %544 = vmatpush3.bf16.msra.mxu1 %v543_v38  ;;  %v147_v62 = vld [vmem:[%s889_s3 + $0x1d0] sm:$0xff]  ;;  %v148_v63 = vld [vmem:[%s889_s3 + $0x1d8] sm:$0xff]  ;;  %v551_v1 = vpack.c.bf16 %v130_v58, %v129_v56  ;;  %v521_v2 = vpack.c.bf16 %v116_v60, %v115_v59  ;;  %v117_v8 = vld [vmem:[%s889_s3 + $0xe0] sm:$0xff] }
  0x10   :  { %546 = vmatprep.subr.bf16.mxu1 %v545_v43  ;;  %v99_v3 = vld [vmem:[%s889_s3 + $0x50] sm:$0xff]  ;;  %v100_v4 = vld [vmem:[%s889_s3 + $0x58] sm:$0xff]  ;;  %v553_v6 = vpack.c.bf16 %v148_v63, %v147_v62  ;;  %v118_v9 = vld [vmem:[%s889_s3 + $0xe8] sm:$0xff] }
  0x11   :  { %516 = vmatpush3.bf16.msra.mxu0 %v515_v49  ;;  %v131_v5 = vld [vmem:[%s889_s3 + $0x150] sm:$0xff]  ;;  %v132_v7 = vld [vmem:[%s889_s3 + $0x158] sm:$0xff]  ;;  %v101_v11 = vld [vmem:[%s889_s3 + $0x60] sm:$0xff]  ;;  %v523_v16 = vpack.c.bf16 %v100_v4, %v99_v3  ;;  %v525_v22 = vpack.c.bf16 %v118_v9, %v117_v8 }
  0x12   :  { %518 = vmatprep.subr.bf16.mxu0 %v517_v53  ;;  %v149_v12 = vld [vmem:[%s889_s3 + $0x1e0] sm:$0xff]  ;;  %v150_v13 = vld [vmem:[%s889_s3 + $0x1e8] sm:$0xff]  ;;  %v555_v21 = vpack.c.bf16 %v132_v7, %v131_v5  ;;  %v119_v27 = vld [vmem:[%s889_s3 + $0xf0] sm:$0xff]  ;;  %v45_v7 = vsub.s32 4, %v745_v61 }
  0x13   :  { %548 = vmatpush3.bf16.msra.mxu1 %v547_v52  ;;  %v102_v17 = vld [vmem:[%s889_s3 + $0x68] sm:$0xff]  ;;  %v133_v18 = vld [vmem:[%s889_s3 + $0x160] sm:$0xff]  ;;  %v557_v26 = vpack.c.bf16 %v150_v13, %v149_v12  ;;  %v120_v28 = vld [vmem:[%s889_s3 + $0xf8] sm:$0xff] }
  0x14   :  { %550 = vmatprep.subr.bf16.mxu1 %v549_v57  ;;  %v134_v19 = vld [vmem:[%s889_s3 + $0x168] sm:$0xff]  ;;  %v799_v24 = vld [vmem:[%s891_s1] sm:$0x1f]  ;;  %v23_v31 = vld [vmem:[%s890_s0 + $0x18] sm:$0xff]  ;;  %v527_v37 = vpack.c.bf16 %v102_v17, %v101_v11  ;;  %v529_v42 = vpack.c.bf16 %v120_v28, %v119_v27 }
  0x15   :  { %520 = vmatpush3.bf16.msra.mxu0 %v519_v0  ;;  %v21_v23 = vld [vmem:[%s890_s0 + $0x8] sm:$0xff]  ;;  %v804_v25 = vld [vmem:[%s892_s2] sm:$0x1f]  ;;  %v34_v29 = vrot.slane %v799_v24, %v33_v10  ;;  %v151_v32 = vld [vmem:[%s889_s3 + $0x1f0] sm:$0xff]  ;;  %v30_v34 = vrot.slane %v799_v24, %v29_v14  ;;  %v42_v35 = vrot.slane %v799_v24, %v41_v15  ;;  %v38_v40 = vrot.slane %v799_v24, %v37_v20 }
  0x16   :  { %522 = vmatprep.subr.bf16.mxu0 %v521_v2  ;;  %v66_v30 = vrot.slane %v804_v25, %v33_v10  ;;  %v152_v33 = vld [vmem:[%s889_s3 + $0x1f8] sm:$0xff]  ;;  %v74_v36 = vrot.slane %v804_v25, %v41_v15  ;;  %v20_v39 = vld [vmem:[%s890_s0] sm:$0xff]  ;;  %v559_v41 = vpack.c.bf16 %v134_v19, %v133_v18  ;;  %v103_v43 = vld [vmem:[%s889_s3 + $0x70] sm:$0xff]  ;;  %v62_v52 = vrot.slane %v804_v25, %v29_v14 }
  0x17   :  { %552 = vmatpush3.bf16.msra.mxu1 %v551_v1  ;;  %v53_v38 = vsub.f32 %v21_v23, %v34_v29  ;;  %v104_v44 = vld [vmem:[%s889_s3 + $0x78] sm:$0xff]  ;;  %v55_v45 = vsub.f32 %v23_v31, %v42_v35  ;;  %v22_v46 = vld [vmem:[%s890_s0 + $0x10] sm:$0xff]  ;;  %v561_v47 = vpack.c.bf16 %v152_v33, %v151_v32  ;;  %v52_v51 = vsub.f32 %v20_v39, %v30_v34  ;;  %v153_v58 = vld [vmem:[%s889_s3 + $0x200] sm:$0xff] }
  0x18   :  { %554 = vmatprep.subr.bf16.mxu1 %v553_v6  ;;  %v135_v49 = vld [vmem:[%s889_s3 + $0x170] sm:$0xff]  ;;  %v136_v50 = vld [vmem:[%s889_s3 + $0x178] sm:$0xff]  ;;  %v531_v54 = vpack.c.bf16 %v104_v44, %v103_v43  ;;  %v54_v55 = vsub.f32 %v22_v46, %v38_v40  ;;  %v70_v56 = vrot.slane %v804_v25, %v37_v20  ;;  %v154_v59 = vld [vmem:[%s889_s3 + $0x208] sm:$0xff]  ;;  %v585_v0 = vmov 0.0|0.0  }
  0x19   :  { %524 = vmatpush3.bf16.msra.mxu0 %v523_v16  ;;  %v85_v48 = vmul.f32 %v66_v30, %v53_v38  ;;  %v87_v53 = vmul.f32 %v74_v36, %v55_v45  ;;  %v563_v57 = vpack.c.bf16 %v136_v50, %v135_v49  ;;  %v84_v60 = vmul.f32 %v62_v52, %v52_v51  ;;  %v155_v1 = vld [vmem:[%s889_s3 + $0x210] sm:$0xff]  ;;  %v156_v2 = vld [vmem:[%s889_s3 + $0x218] sm:$0xff]  ;;  %v157_v4 = vld [vmem:[%s889_s3 + $0x220] sm:$0xff] }
  0x1a   :  { %526 = vmatprep.subr.bf16.mxu0 %v525_v22  ;;  %v566_v62 = vpack.c.bf16 %v154_v59, %v153_v58  ;;  %v86_v63 = vmul.f32 %v70_v56, %v54_v55  ;;  %v569_v3 = vpack.c.bf16 %v156_v2, %v155_v1  ;;  %v158_v5 = vld [vmem:[%s889_s3 + $0x228] sm:$0xff]  ;;  %v587_v6 = vmov 0.0   ;;  %v159_v9 = vld [vmem:[%s889_s3 + $0x230] sm:$0xff]  ;;  %v160_v10 = vld [vmem:[%s889_s3 + $0x238] sm:$0xff] }
  0x1b   :  { %556 = vmatpush3.bf16.msra.mxu1 %v555_v21  ;;  %242 = vmatprep.mubr.f32.mxu0 %v85_v48  ;;  %v572_v8 = vpack.c.bf16 %v158_v5, %v157_v4  ;;  %v46_v11 = vrot.slane %v799_v24, %v45_v7  ;;  %v575_v12 = vpack.c.bf16 %v160_v10, %v159_v9  ;;  %v24_v13 = vld [vmem:[%s890_s0 + $0x20] sm:$0xff]  ;;  %v162_v14 = vld [vmem:[%s889_s3 + $0x248] sm:$0xf]  ;;  %vm579_vm3 = vmpackc.low %vm174_vm1, %vm588_vm2 }
  0x1c   :  { %558 = vmatprep.subr.bf16.mxu1 %v557_v26  ;;  %312 = vmatprep.mubr.f32.mxu1 %v87_v53  ;;  %v161_v61 = vld [vmem:[%s889_s3 + $0x240] sm:$0xff]  ;;  %v78_v16 = vrot.slane %v804_v25, %v45_v7 }
  0x1d   :  { %528 = vmatpush3.bf16.msra.mxu0 %v527_v37  ;;  %v56_v15 = vsub.f32 %v24_v13, %v46_v11  ;;  %v578_v17 = vpack.c.bf16 %v162_v14, %v161_v61  ;;  %v394_v20 = vld [vmem:[%s893_s4] ss:$0 sm:$0xff] }
  0x1e   :  { %530 = vmatprep.subr.bf16.mxu0 %v529_v42 }
  0x1f   :  { %560 = vmatpush3.bf16.msra.mxu1 %v559_v41  ;;  %v88_v18 = vmul.f32 %v78_v16, %v56_v15 }
  0x20   :  { %562 = vmatprep.subr.bf16.mxu1 %v561_v47 }
  0x21   :  { %532 = vmatpush3.bf16.msra.mxu0 %v531_v54 }
  0x22   :  { %565 = vmatprep.subr.bf16.mxu0 %v585_v0 }
  0x23   :  { %564 = vmatpush3.bf16.msra.mxu1 %v563_v57 }
  0x24   :  { %243 = vmatmul.mubr.f32.vlgmr.msra.gmra.mrb[0].mxu0 %v84_v60 }
  0x25   :  { %567 = vmatpush3.bf16.msra.mxu0 %v566_v62  ;;  %498 = vmatprep.mubr.msk.f32.mxu0 %vm586_vm0, %v587_v6 }
  0x26   :  { %313 = vmatmul.mubr.f32.vlgmr.msra.gmra.mrb[0].mxu1 %v86_v63  ;;  %568 = vmatprep.subr.bf16.mxu0 %v585_v0 }
  0x29   :  { %570 = vmatpush3.bf16.msra.mxu0 %v569_v3 }
  0x2a   :  { %571 = vmatprep.subr.bf16.mxu0 %v585_v0 }
  0x2d   :  { %573 = vmatpush3.bf16.msra.mxu0 %v572_v8 }
  0x2e   :  { %574 = vmatprep.subr.bf16.mxu0 %v585_v0 }
  0x31   :  { %576 = vmatpush3.bf16.msra.mxu0 %v575_v12 }
  0x32   :  { %577 = vmatprep.subr.bf16.mxu0 %v585_v0 }
  0x35   :  { %580 = vmatpush3.bf16.msk.msra.mxu0 %vm579_vm3, %v578_v17 }
  0x38   :  { %499 = vmatmul.mubr.msk.f32.vlgmr.msra.gmra.mrb[2].mxu0 %vm170_vm4, %v88_v18 }
  0xf7   :  { %v429_v19 = vpop.f32.mrb[0].mxu0 }
  0xf8   :  { %v430_v21 = vpop.f32.mrb[1].mxu0 }
  0xf9   :  { %v464_v22 = vpop.f32.mrb[0].mxu1  ;;  %v431_v23 = vadd.f32 %v430_v21, %v429_v19 }
  0xfa   :  { %v465_v24 = vpop.f32.mrb[1].mxu1 }
  0xfb   :  { %v466_v26 = vadd.f32 %v465_v24, %v464_v22  ;;  %v245_v25 = vadd.f32 %v431_v23, %v394_v20 }
  0xfd   :  { %v315_v27 = vadd.f32 %v466_v26, %v245_v25 }
 0x10b   :  { %v384_v28 = vpop.f32.mrb[2].mxu0 }
 0x10c   :  { %v385_v29 = vadd.f32 %v384_v28, %v315_v27  ;;  %v500_v30 = vpop.f32.mrb[3].mxu0 }
 0x10e   :  { %389 = vst.msk [vmem:[%s894_s5] sm:$0xff] %vm388_vm5, %v385_v29 }

// kernel: dino_forward.3
= control target key start
LH: loop header
LB: loop body
LE: loop exit
PB: predicated region body
PF: predicated region fallthrough
CT: control target
= control target key end

     0   :  { %s4081_s24 = smov 0   ;;  %s4680_s0 = inlined_call_operand.vmem [shape: f32[18,32], index: 0, kind: input, shape index: {}]   ;;  %s4681_s1 = inlined_call_operand.vmem [shape: f32[10,1,32], index: 1, kind: input, shape index: {}]   ;;  %s4682_s2 = inlined_call_operand.vmem [shape: f32[10,1,32], index: 2, kind: input, shape index: {}]   ;;  %s4683_s3 = inlined_call_operand.vmem [shape: f32[10,32,96], index: 3, kind: input, shape index: {}]   ;;  %s4684_s4 = inlined_call_operand.vmem [shape: f32[10,1,96], index: 4, kind: input, shape index: {}]   ;;  %s4685_s5 = inlined_call_operand.vmem [shape: f32[10,32,32], index: 5, kind: input, shape index: {}]   ;;  %s4686_s6 = inlined_call_operand.vmem [shape: f32[10,1,32], index: 6, kind: input, shape index: {}]   ;;  %s4687_s7 = inlined_call_operand.vmem [shape: f32[10,1,32], index: 7, kind: input, shape index: {}]   ;;  %s4688_s8 = inlined_call_operand.vmem [shape: f32[10,1,32], index: 8, kind: input, shape index: {}]   ;;  %s4689_s9 = inlined_call_operand.vmem [shape: f32[10,1,32], index: 9, kind: input, shape index: {}]   ;;  %s4690_s10 = inlined_call_operand.vmem [shape: f32[10,32,128], index: 10, kind: input, shape index: {}]   ;;  %s4691_s11 = inlined_call_operand.vmem [shape: f32[10,1,128], index: 11, kind: input, shape index: {}]   ;;  %s4692_s12 = inlined_call_operand.vmem [shape: f32[10,128,32], index: 12, kind: input, shape index: {}]   ;;  %s4693_s13 = inlined_call_operand.vmem [shape: f32[10,1,32], index: 13, kind: input, shape index: {}]   ;;  %s4694_s14 = inlined_call_operand.vmem [shape: f32[10,1,32], index: 14, kind: input, shape index: {}]   ;;  %s4695_s15 = inlined_call_operand.vmem [shape: f32[1,32], index: 15, kind: input, shape index: {}]   ;;  %s4696_s16 = inlined_call_operand.vmem [shape: f32[1,32], index: 16, kind: input, shape index: {}]   ;;  %s4697_s17 = inlined_call_operand.vmem [shape: f32[18,32], index: 17, kind: output, shape index: {}]  }
   0x1   :  { %4700 = sst [smem:[#allocation3_spill]] %s4680_s0 }
   0x2   :  { %4701 = sst [smem:[#allocation4_spill]] %s4681_s1 }
   0x3   :  { %4702 = sst [smem:[#allocation5_spill]] %s4682_s2 }
   0x4   :  { %4703 = sst [smem:[#allocation6_spill]] %s4683_s3 }
   0x5   :  { %4704 = sst [smem:[#allocation7_spill]] %s4684_s4 }
   0x6   :  { %4705 = sst [smem:[#allocation8_spill]] %s4685_s5 }
   0x7   :  { %4706 = sst [smem:[#allocation9_spill]] %s4695_s15 }
   0x8   :  { %4707 = sst [smem:[#allocation10_spill]] %s4696_s16 }
   0x9 LB: > { %4708 = sst [smem:[#allocation2_spill]] %s3971_s24  ;;  %s4087_s25 = sadd.s32 4294967295, %s3971_s24   ;;  %s3971_s24 = sphi %s4081_s24, %s27_s24  }
   0xa   : > { %p3228_p0 = scmp.ge.s32.totalorder %s3971_s24, 1  ;;  %p592_p1 = scmp.lt.s32.totalorder %s3971_s24, 11 }
   0xc   : > { %p593_p2 = pnand %p3228_p0, %p592_p1 }
   0xd   : > { %p684_p3 = scmp.lt.s32.totalorder (!%p593_p2), %s4087_s25, 9  ;;  %s4712_s3 = sld [smem:[#allocation6_spill]] (!%p593_p2) }
   0xe   : > { %596 = sbr.rel (%p593_p2) target bundleno = 6640 (0x19f0), region = 88  ;;  %s4713_s5 = sld [smem:[#allocation8_spill]] (!%p593_p2) }
   0xf   : > { %p3237_p4 = scmp.ne.s32.totalorder (!%p593_p2), %s4087_s25, 0 }
  0x15   : > { %s4093_s26 = scalar_select %p684_p3, %s4087_s25, 9 }
  0x16   : > { %737 = sbr.rel (%p3237_p4) target bundleno = 31 (0x1f), region = 92  ;;  %s4714_s16 = sld [smem:[#allocation3_spill]] (!%p3237_p4)  ;;  %vm741_vm0 = vcmask (!%p3237_p4), 261120   ;;  %vm744_vm1 = vcmask (!%p3237_p4), 254976  }
  0x17   : > { %s3318_s1 = sshll.u32 %s4093_s26, 5  ;;  %s722_s29 = scalar_lea.vmem %s4691_s11, %s4093_s26 }
  0x18   : > { %s4111_s28 = scalar_lea.vmem %s4712_s3, %s3318_s1  ;;  %s4116_s15 = scalar_lea.vmem %s4713_s5, %s3318_s1 }
  0x19   : > { %s714_s3 = scalar_lea.vmem %s4689_s9, %s4093_s26  ;;  %s4137_s24 = scalar_lea.vmem %s4690_s10, %s3318_s1 }
  0x1a   : > { %s3321_s30 = sshll.u32 %s4093_s26, 7  ;;  %s730_s2 = scalar_lea.vmem %s4693_s13, %s4093_s26 }
  0x1b   : > { %s4151_s22 = scalar_lea.vmem %s4692_s12, %s3321_s30  ;;  %s733_s4 = scalar_lea.vmem %s4694_s14, %s4093_s26 }
  0x1c   : > { %v738_v0 = vld [vmem:[%s4714_s16] sm:$0xff] (!%p3237_p4)  ;;  %v739_v1 = vld [vmem:[%s4714_s16 + $0x8] sm:$0xff] (!%p3237_p4)  ;;  %v740_v2 = vld [vmem:[%s4714_s16 + $0x10] sm:$0x3] (!%p3237_p4) }
  0x1d   : > { %742 = vst.msk [vmem:[%s4697_s17] sm:$0xff] %vm741_vm0, %v738_v0  ;;  %743 = vst.msk [vmem:[%s4697_s17 + $0x8] sm:$0xff] %vm741_vm0, %v739_v1 }
  0x1e   : > { %745 = vst.msk [vmem:[%s4697_s17 + $0x10] sm:$0x3] %vm744_vm1, %v740_v2 }
  0x1f PF: > { %vm751_vm2 = vcmask 261120   ;;  %vm758_vm3 = vcmask 254976   ;;  %v811_v24 = vld [vmem:[%s4111_s28] sm:$0xff]  ;;  %v812_v25 = vld [vmem:[%s4111_s28 + $0x8] sm:$0xff]  ;;  %v813_v27 = vld [vmem:[%s4111_s28 + $0x10] sm:$0xff]  ;;  %v3973_v29 = vmov 0.0|0.0  }
  0x20   : > { %v3631_v26 = vpack.c.bf16 %v812_v25, %v811_v24  ;;  %v814_v28 = vld [vmem:[%s4111_s28 + $0x18] sm:$0xff]  ;;  %3630 = vmatprep.subr.bf16.mxu0 %v3973_v29  ;;  %vm3974_vm4 = vmmov 0   ;;  %v3975_v30 = vmov 0.0   ;;  %s4715_s27 = sld [smem:[#allocation4_spill]]  ;;  %s4717_s19 = sld [smem:[#allocation5_spill]]  ;;  %vm919_vm5 = vcmask 64512  }
  0x21   : > { %3434 = vmatprep.mubr.msk.f32.mxu0 %vm3974_vm4, %v3975_v30  ;;  %v3634_v31 = vpack.c.bf16 %v814_v28, %v813_v27  ;;  %s4719_s21 = sld [smem:[#allocation7_spill]]  ;;  %s3976_s23 = smov 96   ;;  %vm1755_vm6 = vcmask 1046528   ;;  %vm4245_vm7 = vmpackc.low %vm919_vm5, %vm919_vm5  ;;  %vm1005_vm8 = vcmask 72704   ;;  %vm1009_vm9 = vcmask 65536  }
  0x22   : > { %3632 = vmatpush3.bf16.msra.mxu0 %v3631_v26  ;;  %s3979_s5 = smov 64   ;;  %vm1040_vm10 = vcmask 1040384   ;;  %vm3980_vm11 = vmmov 1   ;;  %s3981_s0 = smov 56   ;;  %vm1747_vm13 = vcmask 130048   ;;  %vm1750_vm14 = vcmask 195584  }
  0x23   : > { %3633 = vmatprep.subr.bf16.mxu0 %v3973_v29  ;;  %vm4262_vm12 = vmpackc.low %vm1040_vm10, %vm3980_vm11  ;;  %s3984_s20 = smov 48   ;;  %s3985_s30 = smov 104  }
  0x24   : > { %p3313_p5 = scmp.ne.s32.totalorder %s4087_s25, 9 }
  0x25   : > { %v748_v7 = vld [vmem:[%s4697_s17 + $0x10] sm:$0x3] }
  0x26   : > { %v746_v3 = vld [vmem:[%s4697_s17] sm:$0xff]  ;;  %v747_v4 = vld [vmem:[%s4697_s17 + $0x8] sm:$0xff]  ;;  %v759_v8 = vsel %vm758_vm3, %v748_v7, 0.0  ;;  %3635 = vmatpush3.bf16.msra.mxu0 %v3634_v31  ;;  %s4716_s1 = scalar_lea.vmem %s4715_s27, %s4093_s26  ;;  %s4718_s18 = scalar_lea.vmem %s4717_s19, %s4093_s26 }
  0x27   : > { %v752_v5 = vsel %vm751_vm2, %v746_v3, 0.0  ;;  %v755_v6 = vsel %vm751_vm2, %v747_v4, 0.0  ;;  %v3238_v42 = vld [vmem:[%s4716_s1] ss:$0 sm:$0xff]  ;;  %s4720_s28 = scalar_lea.vmem %s4719_s21, %s4093_s26  ;;  %s3977_s27 = smov 88  }
  0x28   : > { %753 = vadd.xlane.f32.xlu0 %v752_v5  ;;  %v3239_v44 = vld [vmem:[%s4718_s18] ss:$0 sm:$0xff]  ;;  %s3978_s1 = smov 120   ;;  %s3982_s19 = smov 112  }
  0x29   : > { %v3240_v55 = vld [vmem:[%s4720_s28] ss:$0 sm:$0xff]  ;;  %s3983_s18 = smov 80   ;;  %s3986_s21 = smov 72  }
  0x2a   : > { %s3987_s28 = smov 40  }
  0x2c   : > { %756 = vadd.xlane.f32.xlu0 %v755_v6 }
  0x30   : > { %760 = vadd.xlane.f32.xlu0 %v759_v8 }
  0xb5   : > { %v754_v9 = vpop.xlane.xlu0 %753 }
  0xb6   : > { %v763_v10 = vmul.f32 0.03125, %v754_v9 }
  0xb8   : > { %v766_v11 = vsub.f32 %v746_v3, %v763_v10 }
  0xb9   : > { %v757_v12 = vpop.xlane.xlu0 %756 }
  0xba   : > { %v764_v13 = vmul.f32 0.03125, %v757_v12  ;;  %v769_v14 = vmul.f32 %v766_v11, %v766_v11 }
  0xbc   : > { %v767_v15 = vsub.f32 %v747_v4, %v764_v13  ;;  %v772_v16 = vsel %vm751_vm2, %v769_v14, 0.0 }
  0xbd   : > { %773 = vadd.xlane.f32.xlu1 %v772_v16  ;;  %v761_v17 = vpop.xlane.xlu0 %760 }
  0xbe   : > { %v765_v18 = vmul.f32 0.03125, %v761_v17  ;;  %v770_v19 = vmul.f32 %v767_v15, %v767_v15 }
  0xc0   : > { %v768_v20 = vsub.f32 %v748_v7, %v765_v18  ;;  %v775_v21 = vsel %vm751_vm2, %v770_v19, 0.0 }
  0xc1   : > { %776 = vadd.xlane.f32.xlu1 %v775_v21 }
  0xc2   : > { %v771_v22 = vmul.f32 %v768_v20, %v768_v20 }
  0xc4   : > { %v778_v23 = vsel %vm758_vm3, %v771_v22, 0.0 }
  0xc5   : > { %779 = vadd.xlane.f32.xlu1 %v778_v23 }
 0x14a   : > { %v774_v32 = vpop.xlane.xlu1 %773 }
 0x14b   : > { %v781_v33 = vmul.f32 0.03125, %v774_v32 }
 0x14d   : > { %v784_v34 = vadd.f32 1e-06, %v781_v33 }
 0x14e   : > { %v777_v35 = vpop.xlane.xlu1 %776 }
 0x14f   : > { %3874 = vrsqrt.f32 %v784_v34  ;;  %v782_v36 = vmul.f32 0.03125, %v777_v35 }
 0x151   : > { %v785_v37 = vadd.f32 1e-06, %v782_v36 }
 0x152   : > { %v780_v38 = vpop.xlane.xlu1 %779 }
 0x153   : > { %3876 = vrsqrt.f32 %v785_v37  ;;  %v783_v39 = vmul.f32 0.03125, %v780_v38 }
 0x155   : > { %v786_v40 = vadd.f32 1e-06, %v783_v39 }
 0x157   : > { %3878 = vrsqrt.f32 %v786_v40 }
 0x159   : > { %v3875_v41 = vpop.eup %3874 }
 0x15a   : > { %v790_v43 = vmul.f32 %v3875_v41, %v766_v11 }
 0x15c   : > { %v799_v45 = vmul.f32 %v3238_v42, %v790_v43 }
 0x15d   : > { %v3877_v46 = vpop.eup %3876 }
 0x15e   : > { %v808_v47 = vadd.f32 %v3239_v44, %v799_v45  ;;  %v791_v48 = vmul.f32 %v3877_v46, %v767_v15 }
 0x160   : > { %3435 = vmatmul.mubr.msk.f32.vlgmr.msra.gmra.mrb[0].mxu0 %vm751_vm2, %v808_v47  ;;  %v800_v49 = vmul.f32 %v3238_v42, %v791_v48 }
 0x161   : > { %v3879_v50 = vpop.eup %3878  ;;  %3437 = vmatprep.mubr.msk.f32.mxu0 %vm3974_vm4, %v3975_v30 }
 0x162   : > { %v809_v51 = vadd.f32 %v3239_v44, %v800_v49  ;;  %v792_v52 = vmul.f32 %v3879_v50, %v768_v20 }
 0x164   : > { %3438 = vmatmul.mubr.msk.f32.gmra.mrb[2].mxu0 %vm751_vm2, %v809_v51  ;;  %v801_v53 = vmul.f32 %v3238_v42, %v792_v52 }
 0x165   : > { %3440 = vmatprep.mubr.msk.f32.mxu0 %vm3974_vm4, %v3975_v30 }
 0x166   : > { %v810_v54 = vadd.f32 %v3239_v44, %v801_v53 }
 0x168   : > { %3441 = vmatmul.mubr.msk.f32.gmra.mrb[4].mxu0 %vm751_vm2, %v810_v54 }
 0x233   : > { %v897_v56 = vpop.f32.mrb[0].mxu0 }
 0x234   : > { %v898_v57 = vadd.f32 %v3240_v55, %v897_v56  ;;  %v3436_v58 = vpop.f32.mrb[1].mxu0 }
 0x236   : > { %v4221_v59 = vmul.f32 0.35355338, %v898_v57 }
 0x237   : > { %v902_v60 = vpop.f32.mrb[2].mxu0 }
 0x238   : > { %v903_v61 = vadd.f32 %v3240_v55, %v902_v60  ;;  %v3439_v62 = vpop.f32.mrb[3].mxu0  ;;  %3447 = vmatprep.mubr.msk.f32.mxu0 %vm919_vm5, %v4221_v59 }
 0x23a   : > { %v4225_v63 = vpack.i.bf16 %v903_v61, %v898_v57  ;;  %v1760_v4 = vrot.slane %v903_v61, 1  ;;  %v4239_v7 = vmul.f32 0.35355338, %v903_v61 }
 0x23b   : > { %v907_v0 = vpop.f32.mrb[4].mxu0 }
 0x23c   : > { %v4227_v1 = vadd.f32 %v3240_v55, %v907_v0  ;;  %3795 = vrot.lane.b32.xlu0 %v4225_v63, %s3976_s23  ;;  %v3442_v2 = vpop.f32.mrb[5].mxu0 }
 0x23e   : > { %v1761_v3 = vrot.slane %v4227_v1, 1 }
 0x240   : > { %3805 = vrot.lane.b32.xlu0 %v4225_v63, %s3977_s27  ;;  %v1762_v5 = vsel %vm1755_vm6, %v1760_v4, %v1761_v3 }
 0x241   : > { %v4235_v6 = vpack.i.bf16 %v1761_v3, %v1762_v5 }
 0x244   : > { %1118 = vrot.lane.b32.xlu0 %v4221_v59, %s3978_s1 }
 0x248   : > { %1120 = vrot.lane.b32.xlu0 %v4239_v7, %s3978_s1 }
 0x2ae   : > { %v3796_v8 = vpop.permute.xlu0 %3795 }
 0x2af   : > { %v3798_v9 = vunpack.i.h.bf16 %v3796_v8  ;;  %v3797_v10 = vunpack.i.l.bf16 %v3796_v8 }
 0x2b1   : > { %v3636_v12 = vpack.c.bf16 %v3798_v9, %v3797_v10 }
 0x2b2   : > { %v3806_v31 = vpop.permute.xlu0 %3805 }
 0x2b3   : > { %3638 = vmatprep.subr.msk.bf16.mxu0 %vm4245_vm7, %v3636_v12  ;;  %v3808_v33 = vunpack.i.h.bf16 %v3806_v31  ;;  %v3807_v34 = vunpack.i.l.bf16 %v3806_v31 }
 0x2b4   : > { %3641 = vmatpush3.bf16.xpose.msk.msra.mxu0 %vm4245_vm7, %v3636_v12 }
 0x2b5   : > { %v3648_v39 = vpack.c.bf16 %v3808_v33, %v3807_v34 }
 0x2b6   : > { %v1119_v44 = vpop.permute.xlu0 %1118 }
 0x2ba   : > { %v1121_v45 = vpop.permute.xlu0 %1120 }
 0x2bb   : > { %3448 = vmatmul.mubr.msk.f32.vlgmr.msra.gmra.mrb[6].mxu0 %vm919_vm5, %v4239_v7 }
 0x38e   : > { %v3449_v13 = vpop.f32.mrb[6].mxu0 }
 0x38f   : > { %v996_v14 = vpop.f32.mrb[7].mxu0  ;;  %v1010_v16 = vsel %vm1009_vm9, %v3449_v13, -inf }
 0x390   : > { %v1006_v15 = vsel %vm1005_vm8, %v996_v14, -inf }
 0x391   : > { %1007 = vmax.xlane.f32.xlu1 %v1006_v15 }
 0x395   : > { %1011 = vmax.xlane.f32.xlu1 %v1010_v16 }
 0x41e   : > { %v1008_v17 = vpop.xlane.xlu1 %1007 }
 0x41f   : > { %v1013_v18 = vsub.f32 %v996_v14, %v1008_v17 }
 0x421   : > { %v1015_v21 = vmul.f32 1.442695, %v1013_v18 }
 0x422   : > { %v1012_v19 = vpop.xlane.xlu1 %1011 }
 0x423   : > { %v1014_v20 = vsub.f32 %v3449_v13, %v1012_v19 }
 0x425   : > { %v1017_v22 = vmul.f32 1.442695, %v1014_v20 }
 0x427   : > { %3880 = vpow2.f32 %v1017_v22 }
 0x428   : > { %3882 = vpow2.f32 %v1015_v21 }
 0x431   : > { %v3881_v23 = vpop.eup %3880 }
 0x432   : > { %v1022_v24 = vsel %vm1009_vm9, %v3881_v23, 0.0  ;;  %v3883_v25 = vpop.eup %3882 }
 0x433   : > { %1023 = vadd.xlane.f32.xlu1 %v1022_v24  ;;  %v1019_v26 = vsel %vm1005_vm8, %v3883_v25, 0.0 }
 0x437   : > { %1020 = vadd.xlane.f32.xlu1 %v1019_v26 }
 0x448   : > { %3800 = vrot.lane.b32.xlu1 %v4225_v63, %s3979_s5 }
 0x4c0   : > { %v1024_v27 = vpop.xlane.xlu1 %1023 }
 0x4c1   : > { %3884 = vrcp.f32 %v1024_v27 }
 0x4c4   : > { %v1021_v28 = vpop.xlane.xlu1 %1020 }
 0x4c5   : > { %3886 = vrcp.f32 %v1021_v28 }
 0x4c8   : > { %v3801_v32 = vpop.permute.xlu1 %3800 }
 0x4c9   : > { %v3803_v35 = vunpack.i.h.bf16 %v3801_v32  ;;  %v3802_v36 = vunpack.i.l.bf16 %v3801_v32 }
 0x4cb   : > { %v3642_v38 = vpack.c.bf16 %v3803_v35, %v3802_v36  ;;  %v3885_v40 = vpop.eup %3884 }
 0x4cc   : > { %v1028_v43 = vmul.f32 %v3885_v40, %v3881_v23 }
 0x4cd   : > { %3644 = vmatprep.subr.msk.bf16.mxu0 %vm4262_vm12, %v3642_v38 }
 0x4ce   : > { %3647 = vmatpush3.bf16.msk.msra.mxu0 %vm4262_vm12, %v3642_v38 }
 0x4cf   : > { %v3887_v41 = vpop.eup %3886  ;;  %3650 = vmatprep.subr.msk.bf16.mxu0 %vm4245_vm7, %v3648_v39 }
 0x4d0   : > { %v1026_v42 = vmul.f32 %v3887_v41, %v3883_v25 }
 0x4d2   : > { %3454 = vmatprep.mubr.msk.f32.mxu0 %vm1005_vm8, %v1026_v42 }
 0x4d3   : > { %3455 = vmatmul.mubr.msk.f32.vlgmr.msra.gmra.mrb[8].mxu0 %vm1005_vm8, %v1028_v43 }
 0x4d4   : > { %3461 = vmatprep.mubr.msk.f32.mxu0 %vm919_vm5, %v1119_v44 }
 0x4d7   : > { %3653 = vmatpush3.bf16.xpose.msk.msra.mxu0 %vm4245_vm7, %v3648_v39 }
 0x4de   : > { %3462 = vmatmul.mubr.msk.f32.vlgmr.msra.gmra.mrb[10].mxu0 %vm919_vm5, %v1121_v45 }
 0x5a6   : > { %v4278_v46 = vpop.f32.mrb[8].mxu0 }
 0x5a7   : > { %v4280_v47 = vpop.f32.mrb[9].mxu0 }
 0x5b1   : > { %v3463_v48 = vpop.f32.mrb[10].mxu0 }
 0x5b2   : > { %v1200_v49 = vpop.f32.mrb[11].mxu0  ;;  %v1212_v50 = vsel %vm1009_vm9, %v3463_v48, -inf }
 0x5b3   : > { %1213 = vmax.xlane.f32.xlu0 %v1212_v50  ;;  %v1209_v51 = vsel %vm1005_vm8, %v1200_v49, -inf }
 0x5b4   : > { %1210 = vmax.xlane.f32.xlu1 %v1209_v51 }
 0x5c5   : > { %3810 = vrot.lane.b32.xlu1 %v4225_v63, %s3981_s0 }
 0x5c9   : > { %1319 = vrot.lane.b32.xlu1 %v4221_v59, %s3982_s19 }
 0x5cd   : > { %1321 = vrot.lane.b32.xlu1 %v4239_v7, %s3982_s19 }
 0x640   : > { %v1214_v52 = vpop.xlane.xlu0 %1213 }
 0x641   : > { %v1216_v53 = vsub.f32 %v3463_v48, %v1214_v52  ;;  %v1211_v54 = vpop.xlane.xlu1 %1210 }
 0x642   : > { %v1215_v55 = vsub.f32 %v1200_v49, %v1211_v54 }
 0x643   : > { %v1219_v56 = vmul.f32 1.442695, %v1216_v53 }
 0x644   : > { %v1217_v57 = vmul.f32 1.442695, %v1215_v55 }
 0x645   : > { %3888 = vpow2.f32 %v1219_v56  ;;  %v3811_v58 = vpop.permute.xlu1 %3810 }
 0x646   : > { %v3813_v60 = vunpack.i.h.bf16 %v3811_v58  ;;  %v3812_v61 = vunpack.i.l.bf16 %v3811_v58  ;;  %3890 = vpow2.f32 %v1217_v57 }
 0x648   : > { %v3654_v62 = vpack.c.bf16 %v3813_v60, %v3812_v61 }
 0x649   : > { %v1320_v18 = vpop.permute.xlu1 %1319 }
 0x64a   : > { %3656 = vmatprep.subr.msk.bf16.mxu1 %vm4262_vm12, %v3654_v62 }
 0x64b   : > { %3659 = vmatpush3.bf16.msk.msra.mxu1 %vm4262_vm12, %v3654_v62 }
 0x64d   : > { %v1322_v19 = vpop.permute.xlu1 %1321 }
 0x64f   : > { %v3889_v0 = vpop.eup %3888 }
 0x650   : > { %v1224_v2 = vsel %vm1009_vm9, %v3889_v0, 0.0  ;;  %v3891_v3 = vpop.eup %3890 }
 0x651   : > { %1225 = vadd.xlane.f32.xlu0 %v1224_v2  ;;  %v1221_v4 = vsel %vm1005_vm8, %v3891_v3, 0.0 }
 0x655   : > { %1222 = vadd.xlane.f32.xlu0 %v1221_v4 }
 0x66b   : > { %3815 = vrot.lane.b32.xlu0 %v4225_v63, %s3983_s18 }
 0x6de   : > { %v1226_v5 = vpop.xlane.xlu0 %1225 }
 0x6df   : > { %3892 = vrcp.f32 %v1226_v5 }
 0x6e2   : > { %v1223_v8 = vpop.xlane.xlu0 %1222 }
 0x6e3   : > { %3894 = vrcp.f32 %v1223_v8 }
 0x6e6   : > { %v3816_v9 = vpop.permute.xlu0 %3815 }
 0x6e7   : > { %v3818_v10 = vunpack.i.h.bf16 %v3816_v9  ;;  %v3817_v12 = vunpack.i.l.bf16 %v3816_v9 }
 0x6e9   : > { %v3660_v13 = vpack.c.bf16 %v3818_v10, %v3817_v12  ;;  %v3893_v14 = vpop.eup %3892 }
 0x6ea   : > { %v1230_v17 = vmul.f32 %v3893_v14, %v3889_v0 }
 0x6eb   : > { %3662 = vmatprep.subr.msk.bf16.mxu1 %vm4245_vm7, %v3660_v13 }
 0x6ed   : > { %v3895_v15 = vpop.eup %3894 }
 0x6ee   : > { %v1228_v16 = vmul.f32 %v3895_v15, %v3891_v3 }
 0x6f0   : > { %3468 = vmatprep.mubr.msk.f32.mxu1 %vm1005_vm8, %v1228_v16 }
 0x6f1   : > { %3469 = vmatmul.mubr.msk.f32.vlgmr.msra.gmra.mrb[0].mxu1 %vm1005_vm8, %v1230_v17 }
 0x6f2   : > { %3665 = vmatpush3.bf16.xpose.msk.msra.mxu1 %vm4245_vm7, %v3660_v13  ;;  %3475 = vmatprep.mubr.msk.f32.mxu1 %vm919_vm5, %v1320_v18 }
 0x6f9   : > { %3476 = vmatmul.mubr.msk.f32.vlgmr.msra.gmra.mrb[2].mxu1 %vm919_vm5, %v1322_v19 }
 0x7c4   : > { %v4306_v20 = vpop.f32.mrb[0].mxu1 }
 0x7c5   : > { %v4308_v21 = vpop.f32.mrb[1].mxu1 }
 0x7cc   : > { %v3477_v22 = vpop.f32.mrb[2].mxu1 }
 0x7cd   : > { %v1401_v23 = vpop.f32.mrb[3].mxu1  ;;  %v1413_v24 = vsel %vm1009_vm9, %v3477_v22, -inf }
 0x7ce   : > { %1414 = vmax.xlane.f32.xlu0 %v1413_v24  ;;  %v1410_v25 = vsel %vm1005_vm8, %v1401_v23, -inf  ;;  %v1753_v24 = vmul.f32 0.35355338, %v4227_v1 }
 0x7cf   : > { %1411 = vmax.xlane.f32.xlu1 %v1410_v25 }
 0x7e0   : > { %3820 = vrot.lane.b32.xlu1 %v4225_v63, %s3984_s20 }
 0x7e4   : > { %1520 = vrot.lane.b32.xlu1 %v4221_v59, %s3985_s30 }
 0x7e8   : > { %1522 = vrot.lane.b32.xlu1 %v4239_v7, %s3985_s30 }
 0x85b   : > { %v1415_v26 = vpop.xlane.xlu0 %1414 }
 0x85c   : > { %v1417_v27 = vsub.f32 %v3477_v22, %v1415_v26  ;;  %v1412_v28 = vpop.xlane.xlu1 %1411 }
 0x85d   : > { %v1416_v31 = vsub.f32 %v1401_v23, %v1412_v28  ;;  %v4353_v28 = vrot.slane %v1753_v24, 1 }
 0x85e   : > { %v1420_v32 = vmul.f32 1.442695, %v1417_v27 }
 0x85f   : > { %v1418_v33 = vmul.f32 1.442695, %v1416_v31 }
 0x860   : > { %3896 = vpow2.f32 %v1420_v32  ;;  %v3821_v34 = vpop.permute.xlu1 %3820 }
 0x861   : > { %v3823_v35 = vunpack.i.h.bf16 %v3821_v34  ;;  %v3822_v36 = vunpack.i.l.bf16 %v3821_v34  ;;  %3898 = vpow2.f32 %v1418_v33  ;;  %v1756_v33 = vrot.slane %v4239_v7, 1 }
 0x863   : > { %v3666_v38 = vpack.c.bf16 %v3823_v35, %v3822_v36  ;;  %v4360_v34 = vsel %vm1755_vm6, %v1756_v33, %v4353_v28 }
 0x864   : > { %v1521_v54 = vpop.permute.xlu1 %1520 }
 0x865   : > { %3668 = vmatprep.subr.msk.bf16.mxu0 %vm4262_vm12, %v3666_v38 }
 0x866   : > { %3671 = vmatpush3.bf16.msk.msra.mxu0 %vm4262_vm12, %v3666_v38 }
 0x868   : > { %v1523_v55 = vpop.permute.xlu1 %1522 }
 0x86a   : > { %v3897_v59 = vpop.eup %3896 }
 0x86b   : > { %v1425_v39 = vsel %vm1009_vm9, %v3897_v59, 0.0  ;;  %v3899_v40 = vpop.eup %3898 }
 0x86c   : > { %1426 = vadd.xlane.f32.xlu0 %v1425_v39  ;;  %v1422_v41 = vsel %vm1005_vm8, %v3899_v40, 0.0 }
 0x870   : > { %1423 = vadd.xlane.f32.xlu0 %v1422_v41 }
 0x886   : > { %3825 = vrot.lane.b32.xlu0 %v4225_v63, %s3986_s21 }
 0x8f9   : > { %v1427_v42 = vpop.xlane.xlu0 %1426 }
 0x8fa   : > { %3900 = vrcp.f32 %v1427_v42 }
 0x8fd   : > { %v1424_v43 = vpop.xlane.xlu0 %1423 }
 0x8fe   : > { %3902 = vrcp.f32 %v1424_v43 }
 0x901   : > { %v3826_v44 = vpop.permute.xlu0 %3825 }
 0x902   : > { %v3828_v45 = vunpack.i.h.bf16 %v3826_v44  ;;  %v3827_v48 = vunpack.i.l.bf16 %v3826_v44 }
 0x904   : > { %v3672_v49 = vpack.c.bf16 %v3828_v45, %v3827_v48  ;;  %v3901_v50 = vpop.eup %3900 }
 0x905   : > { %v1431_v53 = vmul.f32 %v3901_v50, %v3897_v59 }
 0x906   : > { %3674 = vmatprep.subr.msk.bf16.mxu0 %vm4245_vm7, %v3672_v49 }
 0x908   : > { %v3903_v51 = vpop.eup %3902 }
 0x909   : > { %v1429_v52 = vmul.f32 %v3903_v51, %v3899_v40 }
 0x90b   : > { %3482 = vmatprep.mubr.msk.f32.mxu0 %vm1005_vm8, %v1429_v52 }
 0x90c   : > { %3483 = vmatmul.mubr.msk.f32.vlgmr.msra.gmra.mrb[12].mxu0 %vm1005_vm8, %v1431_v53 }
 0x90d   : > { %3677 = vmatpush3.bf16.xpose.msk.msra.mxu0 %vm4245_vm7, %v3672_v49  ;;  %3489 = vmatprep.mubr.msk.f32.mxu0 %vm919_vm5, %v1521_v54 }
 0x914   : > { %3490 = vmatmul.mubr.msk.f32.vlgmr.msra.gmra.mrb[14].mxu0 %vm919_vm5, %v1523_v55 }
 0x9df   : > { %v4334_v56 = vpop.f32.mrb[12].mxu0 }
 0x9e0   : > { %v4336_v57 = vpop.f32.mrb[13].mxu0 }
 0x9e7   : > { %v3491_v58 = vpop.f32.mrb[14].mxu0 }
 0x9e8   : > { %v1602_v60 = vpop.f32.mrb[15].mxu0  ;;  %v1614_v61 = vsel %vm1009_vm9, %v3491_v58, -inf }
 0x9e9   : > { %1615 = vmax.xlane.f32.xlu0 %v1614_v61  ;;  %v1611_v62 = vsel %vm1005_vm8, %v1602_v60, -inf }
 0x9ea   : > { %1612 = vmax.xlane.f32.xlu1 %v1611_v62 }
 0x9fb   : > { %3830 = vrot.lane.b32.xlu1 %v4225_v63, %s3987_s28 }
 0xa76   : > { %v1616_v0 = vpop.xlane.xlu0 %1615 }
 0xa77   : > { %v1618_v2 = vsub.f32 %v3491_v58, %v1616_v0  ;;  %v1613_v3 = vpop.xlane.xlu1 %1612 }
 0xa78   : > { %v1617_v4 = vsub.f32 %v1602_v60, %v1613_v3 }
 0xa79   : > { %v1621_v5 = vmul.f32 1.442695, %v1618_v2 }
 0xa7a   : > { %v1619_v8 = vmul.f32 1.442695, %v1617_v4 }
 0xa7b   : > { %3904 = vpow2.f32 %v1621_v5  ;;  %v3831_v9 = vpop.permute.xlu1 %3830 }
 0xa7c   : > { %v3833_v10 = vunpack.i.h.bf16 %v3831_v9  ;;  %v3832_v12 = vunpack.i.l.bf16 %v3831_v9  ;;  %3906 = vpow2.f32 %v1619_v8 }
 0xa7e   : > { %v3678_v13 = vpack.c.bf16 %v3833_v10, %v3832_v12 }
 0xa80   : > { %3680 = vmatprep.subr.msk.bf16.mxu1 %vm4262_vm12, %v3678_v13 }
 0xa81   : > { %3683 = vmatpush3.bf16.msk.msra.mxu1 %vm4262_vm12, %v3678_v13 }
 0xa85   : > { %v3905_v14 = vpop.eup %3904 }
 0xa86   : > { %v1626_v63 = vsel %vm1009_vm9, %v3905_v14, 0.0  ;;  %v3907_v15 = vpop.eup %3906 }
 0xa87   : > { %1627 = vadd.xlane.f32.xlu0 %v1626_v63  ;;  %v1623_v16 = vsel %vm1005_vm8, %v3907_v15, 0.0 }
 0xa8b   : > { %1624 = vadd.xlane.f32.xlu0 %v1623_v16 }
 0xaa1   : > { %3835 = vrot.lane.b32.xlu0 %v4235_v6, %s3976_s23  ;;  %s3988_s23 = smov 16  }
 0xb14   : > { %v1628_v17 = vpop.xlane.xlu0 %1627 }
 0xb15   : > { %3908 = vrcp.f32 %v1628_v17 }
 0xb18   : > { %v1625_v18 = vpop.xlane.xlu0 %1624 }
 0xb19   : > { %3910 = vrcp.f32 %v1625_v18 }
 0xb1c   : > { %v3836_v19 = vpop.permute.xlu0 %3835 }
 0xb1d   : > { %v3838_v22 = vunpack.i.h.bf16 %v3836_v19  ;;  %v3837_v23 = vunpack.i.l.bf16 %v3836_v19 }
 0xb1f   : > { %v3684_v25 = vpack.c.bf16 %v3838_v22, %v3837_v23  ;;  %v3909_v26 = vpop.eup %3908 }
 0xb20   : > { %v1632_v32 = vmul.f32 %v3909_v26, %v3905_v14 }
 0xb21   : > { %3686 = vmatprep.subr.msk.bf16.mxu1 %vm4245_vm7, %v3684_v25 }
 0xb23   : > { %v3911_v27 = vpop.eup %3910 }
 0xb24   : > { %v1630_v31 = vmul.f32 %v3911_v27, %v3907_v15 }
 0xb26   : > { %3496 = vmatprep.mubr.msk.f32.mxu1 %vm1005_vm8, %v1630_v31 }
 0xb27   : > { %3497 = vmatmul.mubr.msk.f32.vlgmr.msra.gmra.mrb[4].mxu1 %vm1005_vm8, %v1632_v32 }
 0xb28   : > { %3689 = vmatpush3.bf16.xpose.msk.msra.mxu1 %vm4245_vm7, %v3684_v25  ;;  %3503 = vmatprep.mubr.msk.f32.mxu1 %vm919_vm5, %v4360_v34 }
 0xb2f   : > { %3504 = vmatmul.mubr.msk.f32.vlgmr.msra.gmra.mrb[6].mxu1 %vm919_vm5, %v4353_v28 }
 0xbfa   : > { %v4368_v1 = vpop.f32.mrb[4].mxu1 }
 0xbfb   : > { %v4370_v7 = vpop.f32.mrb[5].mxu1 }
 0xc02   : > { %v3505_v35 = vpop.f32.mrb[6].mxu1 }
 0xc03   : > { %v1841_v36 = vpop.f32.mrb[7].mxu1  ;;  %v1853_v38 = vsel %vm1009_vm9, %v3505_v35, -inf }
 0xc04   : > { %1854 = vmax.xlane.f32.xlu0 %v1853_v38  ;;  %v1850_v59 = vsel %vm1005_vm8, %v1841_v36, -inf }
 0xc05   : > { %1851 = vmax.xlane.f32.xlu1 %v1850_v59 }
 0xc16   : > { %3840 = vrot.lane.b32.xlu1 %v4235_v6, %s3979_s5  ;;  %s4727_s5 = scalar_lea.vmem %s4688_s8, %s4093_s26 }
 0xc1a   : > { %1960 = vrot.lane.b32.xlu1 %v4360_v34, %s3978_s1 }
 0xc91   : > { %v1855_v39 = vpop.xlane.xlu0 %1854 }
 0xc92   : > { %v1857_v40 = vsub.f32 %v3505_v35, %v1855_v39  ;;  %v1852_v41 = vpop.xlane.xlu1 %1851 }
 0xc93   : > { %v1856_v42 = vsub.f32 %v1841_v36, %v1852_v41 }
 0xc94   : > { %v1860_v43 = vmul.f32 1.442695, %v1857_v40 }
 0xc95   : > { %v1858_v44 = vmul.f32 1.442695, %v1856_v42 }
 0xc96   : > { %3912 = vpow2.f32 %v1860_v43  ;;  %v3841_v45 = vpop.permute.xlu1 %3840 }
 0xc97   : > { %3914 = vpow2.f32 %v1858_v44  ;;  %v3843_v48 = vunpack.i.h.bf16 %v3841_v45  ;;  %v3842_v49 = vunpack.i.l.bf16 %v3841_v45 }
 0xc99   : > { %v3690_v50 = vpack.c.bf16 %v3843_v48, %v3842_v49 }
 0xc9a   : > { %v1961_v55 = vpop.permute.xlu1 %1960 }
 0xc9b   : > { %3692 = vmatprep.subr.msk.bf16.mxu0 %vm4262_vm12, %v3690_v50 }
 0xc9c   : > { %3695 = vmatpush3.bf16.msk.msra.mxu0 %vm4262_vm12, %v3690_v50 }
 0xca0   : > { %v3913_v51 = vpop.eup %3912 }
 0xca1   : > { %v3915_v52 = vpop.eup %3914  ;;  %v1865_v53 = vsel %vm1009_vm9, %v3913_v51, 0.0 }
 0xca2   : > { %1866 = vadd.xlane.f32.xlu0 %v1865_v53  ;;  %v1862_v54 = vsel %vm1005_vm8, %v3915_v52, 0.0 }
 0xca3   : > { %1863 = vadd.xlane.f32.xlu1 %v1862_v54 }
 0xcb4   : > { %1962 = vrot.lane.b32.xlu1 %v4353_v28, %s3978_s1  ;;  %s3990_s1 = smov 24  }
 0xcb8   : > { %3845 = vrot.lane.b32.xlu0 %v4235_v6, %s3977_s27  ;;  %s3989_s27 = smov 8  }
 0xd2f   : > { %v1867_v58 = vpop.xlane.xlu0 %1866 }
 0xd30   : > { %3916 = vrcp.f32 %v1867_v58  ;;  %v1864_v60 = vpop.xlane.xlu1 %1863 }
 0xd31   : > { %3918 = vrcp.f32 %v1864_v60 }
 0xd33   : > { %v3846_v61 = vpop.permute.xlu0 %3845 }
 0xd34   : > { %v3848_v62 = vunpack.i.h.bf16 %v3846_v61  ;;  %v3847_v0 = vunpack.i.l.bf16 %v3846_v61  ;;  %v1963_v9 = vpop.permute.xlu1 %1962 }
 0xd36   : > { %v3696_v2 = vpack.c.bf16 %v3848_v62, %v3847_v0 }
 0xd38   : > { %3698 = vmatprep.subr.msk.bf16.mxu0 %vm4245_vm7, %v3696_v2 }
 0xd3a   : > { %v3917_v3 = vpop.eup %3916 }
 0xd3b   : > { %v3919_v4 = vpop.eup %3918  ;;  %v1871_v8 = vmul.f32 %v3917_v3, %v3913_v51 }
 0xd3c   : > { %v1869_v5 = vmul.f32 %v3919_v4, %v3915_v52 }
 0xd3e   : > { %3510 = vmatprep.mubr.msk.f32.mxu0 %vm1005_vm8, %v1869_v5 }
 0xd3f   : > { %3511 = vmatmul.mubr.msk.f32.vlgmr.msra.gmra.mrb[16].mxu0 %vm1005_vm8, %v1871_v8 }
 0xd40   : > { %3701 = vmatpush3.bf16.xpose.msk.msra.mxu0 %vm4245_vm7, %v3696_v2  ;;  %3517 = vmatprep.mubr.msk.f32.mxu0 %vm919_vm5, %v1961_v55 }
 0xd47   : > { %3518 = vmatmul.mubr.msk.f32.vlgmr.msra.gmra.mrb[18].mxu0 %vm919_vm5, %v1963_v9 }
 0xe12   : > { %v4396_v10 = vpop.f32.mrb[16].mxu0 }
 0xe13   : > { %v4398_v12 = vpop.f32.mrb[17].mxu0 }
 0xe1a   : > { %v3519_v13 = vpop.f32.mrb[18].mxu0 }
 0xe1b   : > { %v2042_v14 = vpop.f32.mrb[19].mxu0  ;;  %v2054_v63 = vsel %vm1009_vm9, %v3519_v13, -inf }
 0xe1c   : > { %2055 = vmax.xlane.f32.xlu0 %v2054_v63  ;;  %v2051_v15 = vsel %vm1005_vm8, %v2042_v14, -inf }
 0xe1d   : > { %2052 = vmax.xlane.f32.xlu1 %v2051_v15 }
 0xe2e   : > { %3850 = vrot.lane.b32.xlu1 %v4235_v6, %s3981_s0  ;;  %s4725_s0 = scalar_lea.vmem %s4686_s6, %s4093_s26 }
 0xe32   : > { %2161 = vrot.lane.b32.xlu1 %v4360_v34, %s3982_s19 }
 0xe36   : > { %2163 = vrot.lane.b32.xlu1 %v4353_v28, %s3982_s19 }
 0xea9   : > { %v2056_v16 = vpop.xlane.xlu0 %2055 }
 0xeaa   : > { %v2058_v17 = vsub.f32 %v3519_v13, %v2056_v16  ;;  %v2053_v18 = vpop.xlane.xlu1 %2052 }
 0xeab   : > { %v2057_v19 = vsub.f32 %v2042_v14, %v2053_v18 }
 0xeac   : > { %v2061_v22 = vmul.f32 1.442695, %v2058_v17 }
 0xead   : > { %v2059_v23 = vmul.f32 1.442695, %v2057_v19 }
 0xeae   : > { %3920 = vpow2.f32 %v2061_v22  ;;  %v3851_v24 = vpop.permute.xlu1 %3850 }
 0xeaf   : > { %v3853_v25 = vunpack.i.h.bf16 %v3851_v24  ;;  %v3852_v26 = vunpack.i.l.bf16 %v3851_v24  ;;  %3922 = vpow2.f32 %v2059_v23 }
 0xeb1   : > { %v3702_v27 = vpack.c.bf16 %v3853_v25, %v3852_v26 }
 0xeb2   : > { %v2162_v48 = vpop.permute.xlu1 %2161 }
 0xeb3   : > { %3704 = vmatprep.subr.msk.bf16.mxu1 %vm4262_vm12, %v3702_v27 }
 0xeb4   : > { %3707 = vmatpush3.bf16.msk.msra.mxu1 %vm4262_vm12, %v3702_v27 }
 0xeb6   : > { %v2164_v49 = vpop.permute.xlu1 %2163 }
 0xeb8   : > { %v3921_v31 = vpop.eup %3920 }
 0xeb9   : > { %v2066_v32 = vsel %vm1009_vm9, %v3921_v31, 0.0  ;;  %v3923_v33 = vpop.eup %3922 }
 0xeba   : > { %2067 = vadd.xlane.f32.xlu0 %v2066_v32  ;;  %v2063_v35 = vsel %vm1005_vm8, %v3923_v33, 0.0 }
 0xebe   : > { %2064 = vadd.xlane.f32.xlu0 %v2063_v35 }
 0xed4   : > { %3855 = vrot.lane.b32.xlu0 %v4235_v6, %s3983_s18 }
 0xf47   : > { %v2068_v36 = vpop.xlane.xlu0 %2067 }
 0xf48   : > { %3924 = vrcp.f32 %v2068_v36 }
 0xf4b   : > { %v2065_v38 = vpop.xlane.xlu0 %2064 }
 0xf4c   : > { %3926 = vrcp.f32 %v2065_v38 }
 0xf4f   : > { %v3856_v59 = vpop.permute.xlu0 %3855 }
 0xf50   : > { %v3858_v39 = vunpack.i.h.bf16 %v3856_v59  ;;  %v3857_v40 = vunpack.i.l.bf16 %v3856_v59 }
 0xf52   : > { %v3708_v41 = vpack.c.bf16 %v3858_v39, %v3857_v40  ;;  %v3925_v42 = vpop.eup %3924 }
 0xf53   : > { %v2072_v45 = vmul.f32 %v3925_v42, %v3921_v31 }
 0xf54   : > { %3710 = vmatprep.subr.msk.bf16.mxu1 %vm4245_vm7, %v3708_v41 }
 0xf56   : > { %v3927_v43 = vpop.eup %3926 }
 0xf57   : > { %v2070_v44 = vmul.f32 %v3927_v43, %v3923_v33 }
 0xf59   : > { %3524 = vmatprep.mubr.msk.f32.mxu1 %vm1005_vm8, %v2070_v44 }
 0xf5a   : > { %3525 = vmatmul.mubr.msk.f32.vlgmr.msra.gmra.mrb[8].mxu1 %vm1005_vm8, %v2072_v45 }
 0xf5b   : > { %3713 = vmatpush3.bf16.xpose.msk.msra.mxu1 %vm4245_vm7, %v3708_v41  ;;  %3531 = vmatprep.mubr.msk.f32.mxu1 %vm919_vm5, %v2162_v48 }
 0xf62   : > { %3532 = vmatmul.mubr.msk.f32.vlgmr.msra.gmra.mrb[10].mxu1 %vm919_vm5, %v2164_v49 }
0x102d   : > { %v4424_v50 = vpop.f32.mrb[8].mxu1 }
0x102e   : > { %v4426_v51 = vpop.f32.mrb[9].mxu1 }
0x1035   : > { %v3533_v52 = vpop.f32.mrb[10].mxu1 }
0x1036   : > { %v2243_v53 = vpop.f32.mrb[11].mxu1  ;;  %v2255_v54 = vsel %vm1009_vm9, %v3533_v52, -inf }
0x1037   : > { %2256 = vmax.xlane.f32.xlu0 %v2255_v54  ;;  %v2252_v55 = vsel %vm1005_vm8, %v2243_v53, -inf }
0x1038   : > { %2253 = vmax.xlane.f32.xlu1 %v2252_v55 }
0x1049   : > { %3860 = vrot.lane.b32.xlu1 %v4235_v6, %s3984_s20  ;;  %s4726_s20 = scalar_lea.vmem %s4687_s7, %s4093_s26 }
0x104d   : > { %2362 = vrot.lane.b32.xlu1 %v4360_v34, %s3985_s30 }
0x1051   : > { %2364 = vrot.lane.b32.xlu1 %v4353_v28, %s3985_s30 }
0x10c4   : > { %v2257_v58 = vpop.xlane.xlu0 %2256 }
0x10c5   : > { %v2259_v60 = vsub.f32 %v3533_v52, %v2257_v58  ;;  %v2254_v61 = vpop.xlane.xlu1 %2253  ;;  %v2600_v52 = vld [vmem:[%s4116_s15] sm:$0xff] }
0x10c6   : > { %v2258_v62 = vsub.f32 %v2243_v53, %v2254_v61  ;;  %v2601_v53 = vld [vmem:[%s4116_s15 + $0x8] sm:$0xff]  ;;  %v2603_v61 = vld [vmem:[%s4116_s15 + $0x18] sm:$0xff] }
0x10c7   : > { %v2262_v0 = vmul.f32 1.442695, %v2259_v60  ;;  %v3733_v55 = vpack.c.bf16 %v2601_v53, %v2600_v52  ;;  %v2602_v60 = vld [vmem:[%s4116_s15 + $0x10] sm:$0xff]  ;;  %v2771_v53 = vld [vmem:[%s4137_s24] sm:$0xff] }
0x10c8   : > { %v2260_v2 = vmul.f32 1.442695, %v2258_v62  ;;  %v3736_v62 = vpack.c.bf16 %v2603_v61, %v2602_v60 }
0x10c9   : > { %3928 = vpow2.f32 %v2262_v0  ;;  %v3861_v3 = vpop.permute.xlu1 %3860 }
0x10ca   : > { %v3863_v4 = vunpack.i.h.bf16 %v3861_v3  ;;  %v3862_v5 = vunpack.i.l.bf16 %v3861_v3  ;;  %3930 = vpow2.f32 %v2260_v2 }
0x10cc   : > { %v3714_v8 = vpack.c.bf16 %v3863_v4, %v3862_v5 }
0x10cd   : > { %v2363_v25 = vpop.permute.xlu1 %2362 }
0x10ce   : > { %3716 = vmatprep.subr.msk.bf16.mxu0 %vm4262_vm12, %v3714_v8 }
0x10cf   : > { %3719 = vmatpush3.bf16.msk.msra.mxu0 %vm4262_vm12, %v3714_v8 }
0x10d1   : > { %v2365_v26 = vpop.permute.xlu1 %2364 }
0x10d3   : > { %v3929_v34 = vpop.eup %3928 }
0x10d4   : > { %v2267_v28 = vsel %vm1009_vm9, %v3929_v34, 0.0  ;;  %v3931_v9 = vpop.eup %3930 }
0x10d5   : > { %2268 = vadd.xlane.f32.xlu0 %v2267_v28  ;;  %v2264_v13 = vsel %vm1005_vm8, %v3931_v9, 0.0 }
0x10d9   : > { %2265 = vadd.xlane.f32.xlu0 %v2264_v13 }
0x10ef   : > { %3865 = vrot.lane.b32.xlu0 %v4235_v6, %s3986_s21 }
0x1162   : > { %v2269_v14 = vpop.xlane.xlu0 %2268 }
0x1163   : > { %3932 = vrcp.f32 %v2269_v14  ;;  %v3956_v14 = vld [vmem:[%s4697_s17] sm:$0xff] }
0x1166   : > { %v2266_v63 = vpop.xlane.xlu0 %2265 }
0x1167   : > { %3934 = vrcp.f32 %v2266_v63 }
0x116a   : > { %v3866_v15 = vpop.permute.xlu0 %3865 }
0x116b   : > { %v3868_v16 = vunpack.i.h.bf16 %v3866_v15  ;;  %v3867_v17 = vunpack.i.l.bf16 %v3866_v15 }
0x116d   : > { %v3720_v18 = vpack.c.bf16 %v3868_v16, %v3867_v17  ;;  %v3933_v19 = vpop.eup %3932 }
0x116e   : > { %v2273_v24 = vmul.f32 %v3933_v19, %v3929_v34  ;;  %v3300_v34 = vld [vmem:[%s4725_s0] ss:$0 sm:$0xff] }
0x116f   : > { %3722 = vmatprep.subr.msk.bf16.mxu0 %vm4245_vm7, %v3720_v18 }
0x1171   : > { %v3935_v22 = vpop.eup %3934 }
0x1172   : > { %v2271_v23 = vmul.f32 %v3935_v22, %v3931_v9  ;;  %v3304_v9 = vld [vmem:[%s4726_s20] ss:$0 sm:$0xff] }
0x1174   : > { %3538 = vmatprep.mubr.msk.f32.mxu0 %vm1005_vm8, %v2271_v23 }
0x1175   : > { %3539 = vmatmul.mubr.msk.f32.vlgmr.msra.gmra.mrb[20].mxu0 %vm1005_vm8, %v2273_v24 }
0x1176   : > { %3725 = vmatpush3.bf16.xpose.msk.msra.mxu0 %vm4245_vm7, %v3720_v18  ;;  %3545 = vmatprep.mubr.msk.f32.mxu0 %vm919_vm5, %v2363_v25 }
0x1177   : > { %3738 = vmatprep.subr.bf16.mxu0 %v3973_v29 }
0x117d   : > { %3546 = vmatmul.mubr.msk.f32.vlgmr.msra.gmra.mrb[22].mxu0 %vm919_vm5, %v2365_v26 }
0x117e   : > { %3580 = vmatprep.mubr.msk.f32.mxu0 %vm3974_vm4, %v3975_v30 }
0x1248   : > { %v4455_v27 = vpop.f32.mrb[20].mxu0 }
0x1249   : > { %v2353_v31 = vpop.f32.mrb[21].mxu0 }
0x1250   : > { %v3547_v32 = vpop.f32.mrb[22].mxu0 }
0x1251   : > { %v2444_v33 = vpop.f32.mrb[23].mxu0  ;;  %v2456_v35 = vsel %vm1009_vm9, %v3547_v32, -inf }
0x1252   : > { %2457 = vmax.xlane.f32.xlu0 %v2456_v35  ;;  %v2453_v11 = vsel %vm1005_vm8, %v2444_v33, -inf }
0x1253   : > { %2454 = vmax.xlane.f32.xlu1 %v2453_v11 }
0x1264   : > { %3870 = vrot.lane.b32.xlu1 %v4235_v6, %s3987_s28 }
0x1268   : > { %1731 = vrot.lane.b32.xlu1 %v4336_v57, %s3988_s23 }
0x126c   : > { %2565 = vrot.lane.b32.xlu1 %v4426_v51, %s3989_s27 }
0x1270   : > { %1739 = vrot.lane.b32.xlu1 %v4370_v7, %s3990_s1 }
0x1274   : > { %1725 = vrot.lane.b32.xlu1 %v4306_v20, %s3989_s27 }
0x1278   : > { %1733 = vrot.lane.b32.xlu1 %v4334_v56, %s3988_s23 }
0x127c   : > { %2567 = vrot.lane.b32.xlu1 %v4424_v50, %s3989_s27 }
0x12df   : > { %v2458_v6 = vpop.xlane.xlu0 %2457 }
0x12e0   : > { %v2460_v36 = vsub.f32 %v3547_v32, %v2458_v6  ;;  %v2455_v57 = vpop.xlane.xlu1 %2454 }
0x12e1   : > { %v2459_v38 = vsub.f32 %v2444_v33, %v2455_v57 }
0x12e2   : > { %v2463_v59 = vmul.f32 1.442695, %v2460_v36 }
0x12e3   : > { %v2461_v39 = vmul.f32 1.442695, %v2459_v38 }
0x12e4   : > { %v3871_v40 = vpop.permute.xlu1 %3870 }
0x12e5   : > { %3936 = vpow2.f32 %v2461_v39  ;;  %v3873_v41 = vunpack.i.h.bf16 %v3871_v40  ;;  %v3872_v42 = vunpack.i.l.bf16 %v3871_v40 }
0x12e6   : > { %3938 = vpow2.f32 %v2463_v59 }
0x12e7   : > { %v3726_v7 = vpack.c.bf16 %v3873_v41, %v3872_v42 }
0x12e8   : > { %v1732_v43 = vpop.permute.xlu1 %1731 }
0x12e9   : > { %3728 = vmatprep.subr.msk.bf16.mxu1 %vm4262_vm12, %v3726_v7 }
0x12ea   : > { %3731 = vmatpush3.bf16.msk.msra.mxu1 %vm4262_vm12, %v3726_v7  ;;  %v3957_v7 = vld [vmem:[%s4697_s17 + $0x8] sm:$0xff] }
0x12eb   : > { %3732 = vmatprep.subr.bf16.mxu1 %v3973_v29 }
0x12ec   : > { %v2566_v20 = vpop.permute.xlu1 %2565 }
0x12ed   : > { %v2587_v56 = vsel %vm919_vm5, %v4398_v12, %v2566_v20 }
0x12ef   : > { %v3937_v44 = vpop.eup %3936 }
0x12f0   : > { %v2465_v45 = vsel %vm1005_vm8, %v3937_v44, 0.0  ;;  %v3939_v48 = vpop.eup %3938  ;;  %v1740_v2 = vpop.permute.xlu1 %1739 }
0x12f1   : > { %2466 = vadd.xlane.f32.xlu0 %v2465_v45  ;;  %v2468_v49 = vsel %vm1009_vm9, %v3939_v48, 0.0 }
0x12f4   : > { %v1726_v16 = vpop.permute.xlu1 %1725 }
0x12f5   : > { %2469 = vadd.xlane.f32.xlu0 %v2468_v49  ;;  %v1746_v24 = vsel %vm919_vm5, %v4278_v46, %v1726_v16  ;;  %v3306_v16 = vld [vmem:[%s714_s3] ss:$0 sm:$0xff] }
0x12f8   : > { %v1734_v18 = vpop.permute.xlu1 %1733 }
0x12fc   : > { %v2568_v25 = vpop.permute.xlu1 %2567 }
0x12fd   : > { %v2588_v33 = vsel %vm919_vm5, %v4396_v10, %v2568_v25  ;;  %v2889_v25 = vld [vmem:[%s4151_s22 + $0x18] sm:$0xff] }
0x130b   : > { %1723 = vrot.lane.b32.xlu0 %v4308_v21, %s3989_s27 }
0x130f   : > { %2573 = vrot.lane.b32.xlu0 %v2353_v31, %s3988_s23 }
0x1313   : > { %1741 = vrot.lane.b32.xlu0 %v4368_v1, %s3990_s1 }
0x137e   : > { %v2467_v37 = vpop.xlane.xlu0 %2466 }
0x137f   : > { %3940 = vrcp.f32 %v2467_v37  ;;  %v3958_v37 = vld [vmem:[%s4697_s17 + $0x10] sm:$0x3] }
0x1382   : > { %v2470_v12 = vpop.xlane.xlu0 %2469 }
0x1383   : > { %3942 = vrcp.f32 %v2470_v12 }
0x1386   : > { %v1724_v58 = vpop.permute.xlu0 %1723 }
0x1387   : > { %v1745_v1 = vsel %vm919_vm5, %v4280_v47, %v1724_v58  ;;  %v2774_v58 = vld [vmem:[%s4137_s24 + $0x18] sm:$0xff] }
0x1388   : > { %v1748_v0 = vsel %vm1747_vm13, %v1745_v1, %v1732_v43 }
0x1389   : > { %v3941_v50 = vpop.eup %3940  ;;  %v1751_v3 = vsel %vm1750_vm14, %v1748_v0, %v1740_v2 }
0x138a   : > { %v2472_v51 = vmul.f32 %v3941_v50, %v3937_v44  ;;  %v2574_v17 = vpop.permute.xlu0 %2573 }
0x138b   : > { %v2589_v22 = vsel %vm1747_vm13, %v2587_v56, %v2574_v17 }
0x138c   : > { %3552 = vmatprep.mubr.msk.f32.mxu1 %vm1005_vm8, %v2472_v51 }
0x138d   : > { %v3943_v54 = vpop.eup %3942 }
0x138e   : > { %v2474_v21 = vmul.f32 %v3943_v54, %v3939_v48  ;;  %v1742_v19 = vpop.permute.xlu0 %1741  ;;  %v2772_v54 = vld [vmem:[%s4137_s24 + $0x8] sm:$0xff] }
0x1390   : > { %3553 = vmatmul.mubr.msk.f32.vlgmr.msra.gmra.mrb[12].mxu1 %vm1005_vm8, %v2474_v21  ;;  %v2773_v21 = vld [vmem:[%s4137_s24 + $0x10] sm:$0xff] }
0x1391   : > { %3734 = vmatpush3.bf16.msra.mxu1 %v3733_v55  ;;  %3563 = vmatprep.mubr.msk.f32.mxu1 %vm3974_vm4, %v3975_v30  ;;  %v3739_v55 = vpack.c.bf16 %v2772_v54, %v2771_v53  ;;  %v3742_v60 = vpack.c.bf16 %v2774_v58, %v2773_v21  ;;  %v3307_v21 = vld [vmem:[%s722_s29] ss:$0 sm:$0xff] }
0x1392   : > { %3735 = vmatprep.subr.bf16.mxu1 %v3973_v29 }
0x1393   : > { %3740 = vmatpush3.bf16.msra.mxu0 %v3739_v55 }
0x1394   : > { %3741 = vmatprep.subr.bf16.mxu0 %v3973_v29 }
0x1395   : > { %3737 = vmatpush3.bf16.msra.mxu1 %v3736_v62 }
0x1396   : > { %3744 = vmatprep.subr.bf16.mxu1 %v3973_v29 }
0x1397   : > { %3743 = vmatpush3.bf16.msra.mxu0 %v3742_v60 }
0x1398   : > { %3564 = vmatmul.mubr.msk.f32.vlgmr.msra.gmra.mrb[14].mxu1 %vm751_vm2, %v1751_v3 }
0x1399   : > { %3566 = vmatprep.mubr.msk.f32.mxu1 %vm3974_vm4, %v3975_v30 }
0x1463   : > { %v3554_v47 = vpop.f32.mrb[12].mxu1 }
0x1464   : > { %2583 = vrot.lane.b32.xlu1 %v3554_v47, %s3990_s1  ;;  %v2554_v4 = vpop.f32.mrb[13].mxu1 }
0x1465   : > { %2581 = vrot.lane.b32.xlu0 %v2554_v4, %s3990_s1  ;;  %s4728_s1 = sld [smem:[#allocation9_spill]] (!%p3313_p5) }
0x1469   : > { %2575 = vrot.lane.b32.xlu0 %v4455_v27, %s3988_s23  ;;  %v1749_v27 = vsel %vm1747_vm13, %v1746_v24, %v1734_v18 }
0x146a   : > { %v1752_v32 = vsel %vm1750_vm14, %v1749_v27, %v1742_v19  ;;  %v2886_v19 = vld [vmem:[%s4151_s22] sm:$0xff] }
0x146b   : > { %v2685_v5 = vpop.f32.mrb[14].mxu1  ;;  %v2890_v27 = vld [vmem:[%s4151_s22 + $0x20] sm:$0xff] }
0x146c   : > { %v3565_v8 = vpop.f32.mrb[15].mxu1  ;;  %v2686_v28 = vadd.f32 %v3300_v34, %v2685_v5 }
0x146e   : > { %v2706_v13 = vmul.f32 %v3304_v9, %v2686_v28 }
0x1470   : > { %v4521_v63 = vadd.f32 %v3956_v14, %v2706_v13  ;;  %v3305_v14 = vld [vmem:[%s4727_s5] ss:$0 sm:$0xff]  ;;  %s4729_s5 = sld [smem:[#allocation10_spill]] (!%p3313_p5) }
0x1472   : > { %v2714_v15 = vsel %vm751_vm2, %v4521_v63, 0.0 }
0x1488   : > { %2715 = vadd.xlane.f32.xlu0 %v2714_v15 }
0x14d6   : > { %v2584_v6 = vpop.permute.xlu1 %2583 }
0x14d7   : > { %v2582_v23 = vpop.permute.xlu0 %2581 }
0x14d8   : > { %v2591_v26 = vsel %vm1750_vm14, %v2589_v22, %v2582_v23  ;;  %v2887_v22 = vld [vmem:[%s4151_s22 + $0x8] sm:$0xff]  ;;  %v2888_v23 = vld [vmem:[%s4151_s22 + $0x10] sm:$0xff] }
0x14d9   : > { %v2595_v31 = vrot.slane %v2591_v26, 7  ;;  %v3745_v24 = vpack.c.bf16 %v2887_v22, %v2886_v19  ;;  %v3748_v26 = vpack.c.bf16 %v2889_v25, %v2888_v23 }
0x14db   : > { %v2576_v35 = vpop.permute.xlu0 %2575  ;;  %v2599_v11 = vsel %vm1040_vm10, %v1752_v32, %v2595_v31  ;;  %3746 = vmatpush3.bf16.msra.mxu1 %v3745_v24  ;;  %v3311_v24 = vld [vmem:[%s730_s2] ss:$0 sm:$0xff] }
0x14dc   : > { %v2590_v36 = vsel %vm1747_vm13, %v2588_v33, %v2576_v35  ;;  %3567 = vmatmul.mubr.msk.f32.gmra.mrb[16].mxu1 %vm751_vm2, %v2599_v11  ;;  %3747 = vmatprep.subr.bf16.mxu1 %v3973_v29  ;;  %v2892_v33 = vld [vmem:[%s4151_s22 + $0x30] sm:$0xff]  ;;  %v2893_v35 = vld [vmem:[%s4151_s22 + $0x38] sm:$0xff] }
0x14dd   : > { %v2592_v46 = vsel %vm1750_vm14, %v2590_v36, %v2584_v6  ;;  %3569 = vmatprep.mubr.msk.f32.mxu1 %vm3974_vm4, %v3975_v30  ;;  %v3754_v11 = vpack.c.bf16 %v2893_v35, %v2892_v33  ;;  %v2894_v6 = vld [vmem:[%s4151_s22 + $0x40] sm:$0xff]  ;;  %v2895_v36 = vld [vmem:[%s4151_s22 + $0x48] sm:$0xff] }
0x14de   : > { %v2596_v57 = vrot.slane %v2592_v46, 7  ;;  %v3757_v46 = vpack.c.bf16 %v2895_v36, %v2894_v6 }
0x14df   : > { %3749 = vmatpush3.bf16.msra.mxu1 %v3748_v26  ;;  %v3312_v26 = vld [vmem:[%s733_s4] ss:$0 sm:$0xff] }
0x14e0   : > { %v2597_v38 = vsel %vm1040_vm10, %v2595_v31, %v2596_v57  ;;  %v2891_v31 = vld [vmem:[%s4151_s22 + $0x28] sm:$0xff]  ;;  %3750 = vmatprep.subr.bf16.mxu1 %v3973_v29  ;;  %v2896_v57 = vld [vmem:[%s4151_s22 + $0x50] sm:$0xff] }
0x14e1   : > { %3570 = vmatmul.mubr.msk.f32.gmra.mrb[18].mxu1 %vm751_vm2, %v2597_v38  ;;  %v3751_v32 = vpack.c.bf16 %v2891_v31, %v2890_v27  ;;  %v2897_v38 = vld [vmem:[%s4151_s22 + $0x58] sm:$0xff] }
0x14e2   : > { %3621 = vmatprep.mubr.msk.f32.mxu1 %vm3974_vm4, %v3975_v30 }
0x14e3   : > { %3752 = vmatpush3.bf16.msra.mxu1 %v3751_v32 }
0x14e4   : > { %3753 = vmatprep.subr.bf16.mxu1 %v3973_v29 }
0x14e7   : > { %3755 = vmatpush3.bf16.msra.mxu1 %v3754_v11 }
0x14e8   : > { %3756 = vmatprep.subr.bf16.mxu1 %v3973_v29 }
0x14eb   : > { %3758 = vmatpush3.bf16.msra.mxu1 %v3757_v46 }
0x14ec   : > { %3759 = vmatprep.subr.bf16.mxu1 %v3973_v29 }
0x1515   : > { %v2716_v59 = vpop.xlane.xlu0 %2715 }
0x1516   : > { %v2723_v42 = vmul.f32 0.03125, %v2716_v59  ;;  %v2898_v59 = vld [vmem:[%s4151_s22 + $0x60] sm:$0xff] }
0x1518   : > { %v2726_v48 = vsub.f32 %v4521_v63, %v2723_v42  ;;  %v2901_v42 = vld [vmem:[%s4151_s22 + $0x78] sm:$0xff] }
0x151a   : > { %v2729_v51 = vmul.f32 %v2726_v48, %v2726_v48 }
0x151c   : > { %v2732_v52 = vsel %vm751_vm2, %v2729_v51, 0.0 }
0x15af   : > { %v2690_v10 = vpop.f32.mrb[16].mxu1 }
0x15b0   : > { %v2691_v39 = vadd.f32 %v3300_v34, %v2690_v10  ;;  %v3568_v40 = vpop.f32.mrb[17].mxu1  ;;  %v3760_v10 = vpack.c.bf16 %v2897_v38, %v2896_v57 }
0x15b2   : > { %v2707_v41 = vmul.f32 %v3304_v9, %v2691_v39  ;;  %3761 = vmatpush3.bf16.msra.mxu1 %v3760_v10  ;;  %v2899_v39 = vld [vmem:[%s4151_s22 + $0x68] sm:$0xff] }
0x15b3   : > { %3762 = vmatprep.subr.bf16.mxu1 %v3973_v29  ;;  %v3763_v40 = vpack.c.bf16 %v2899_v39, %v2898_v59 }
0x15b4   : > { %v4546_v43 = vadd.f32 %v3957_v7, %v2707_v41  ;;  %v2695_v20 = vpop.f32.mrb[18].mxu1  ;;  %v2900_v41 = vld [vmem:[%s4151_s22 + $0x70] sm:$0xff] }
0x15b5   : > { %v2696_v56 = vadd.f32 %v3300_v34, %v2695_v20  ;;  %v3571_v44 = vpop.f32.mrb[19].mxu1  ;;  %v3766_v7 = vpack.c.bf16 %v2901_v42, %v2900_v41 }
0x15b6   : > { %v2717_v45 = vsel %vm751_vm2, %v4546_v43, 0.0  ;;  %3764 = vmatpush3.bf16.msra.mxu1 %v3763_v40 }
0x15b7   : > { %v2708_v49 = vmul.f32 %v3304_v9, %v2696_v56  ;;  %2718 = vadd.xlane.f32.xlu1 %v2717_v45  ;;  %3765 = vmatprep.subr.bf16.mxu1 %v3973_v29 }
0x15b9   : > { %v4554_v12 = vadd.f32 %v3958_v37, %v2708_v49 }
0x15ba   : > { %3767 = vmatpush3.bf16.msra.mxu1 %v3766_v7 }
0x15bb   : > { %v2720_v50 = vsel %vm758_vm3, %v4554_v12, 0.0 }
0x15bc   : > { %2721 = vadd.xlane.f32.xlu0 %v2720_v50 }
0x15c0   : > { %2733 = vadd.xlane.f32.xlu0 %v2732_v52 }
0x1644   : > { %v2719_v61 = vpop.xlane.xlu1 %2718 }
0x1645   : > { %v2724_v1 = vmul.f32 0.03125, %v2719_v61 }
0x1647   : > { %v4565_v62 = vsub.f32 %v4546_v43, %v2724_v1 }
0x1649   : > { %v2722_v0 = vpop.xlane.xlu0 %2721  ;;  %v2730_v2 = vmul.f32 %v4565_v62, %v4565_v62 }
0x164a   : > { %v2725_v3 = vmul.f32 0.03125, %v2722_v0 }
0x164b   : > { %v2735_v47 = vsel %vm751_vm2, %v2730_v2, 0.0 }
0x164c   : > { %v4571_v4 = vsub.f32 %v4554_v12, %v2725_v3  ;;  %2736 = vadd.xlane.f32.xlu0 %v2735_v47 }
0x164d   : > { %v2734_v5 = vpop.xlane.xlu0 %2733 }
0x164e   : > { %v2741_v8 = vmul.f32 0.03125, %v2734_v5  ;;  %v2731_v34 = vmul.f32 %v4571_v4, %v4571_v4 }
0x1650   : > { %v2744_v28 = vadd.f32 1e-06, %v2741_v8  ;;  %v2738_v9 = vsel %vm758_vm3, %v2731_v34, 0.0 }
0x1651   : > { %2739 = vadd.xlane.f32.xlu1 %v2738_v9 }
0x1652   : > { %3944 = vrsqrt.f32 %v2744_v28 }
0x165c   : > { %v3945_v13 = vpop.eup %3944 }
0x165d   : > { %v2750_v15 = vmul.f32 %v3945_v13, %v2726_v48 }
0x165f   : > { %v2759_v17 = vmul.f32 %v3305_v14, %v2750_v15 }
0x1661   : > { %v2768_v18 = vadd.f32 %v3306_v16, %v2759_v17 }
0x1663   : > { %3581 = vmatmul.mubr.msk.f32.vlgmr.msra.gmra.mrb[24].mxu0 %vm751_vm2, %v2768_v18 }
0x1664   : > { %3583 = vmatprep.mubr.msk.f32.mxu0 %vm3974_vm4, %v3975_v30 }
0x16d9   : > { %v2737_v20 = vpop.xlane.xlu0 %2736 }
0x16da   : > { %v2742_v56 = vmul.f32 0.03125, %v2737_v20 }
0x16dc   : > { %v2745_v44 = vadd.f32 1e-06, %v2742_v56 }
0x16de   : > { %3946 = vrsqrt.f32 %v2745_v44  ;;  %v2740_v45 = vpop.xlane.xlu1 %2739 }
0x16df   : > { %v2743_v48 = vmul.f32 0.03125, %v2740_v45 }
0x16e1   : > { %v2746_v49 = vadd.f32 1e-06, %v2743_v48 }
0x16e3   : > { %3948 = vrsqrt.f32 %v2746_v49 }
0x16e8   : > { %v3947_v37 = vpop.eup %3946 }
0x16e9   : > { %v2751_v50 = vmul.f32 %v3947_v37, %v4565_v62 }
0x16eb   : > { %v2760_v51 = vmul.f32 %v3305_v14, %v2751_v50 }
0x16ed   : > { %v3949_v52 = vpop.eup %3948  ;;  %v2769_v53 = vadd.f32 %v3306_v16, %v2760_v51 }
0x16ee   : > { %v2752_v29 = vmul.f32 %v3949_v52, %v4571_v4 }
0x16ef   : > { %3584 = vmatmul.mubr.msk.f32.gmra.mrb[26].mxu0 %vm751_vm2, %v2769_v53 }
0x16f0   : > { %3586 = vmatprep.mubr.msk.f32.mxu0 %vm3974_vm4, %v3975_v30  ;;  %v2761_v54 = vmul.f32 %v3305_v14, %v2752_v29 }
0x16f2   : > { %v2770_v55 = vadd.f32 %v3306_v16, %v2761_v54 }
0x16f4   : > { %3587 = vmatmul.mubr.msk.f32.gmra.mrb[28].mxu0 %vm751_vm2, %v2770_v55 }
0x1736   : > { %v2857_v58 = vpop.f32.mrb[24].mxu0 }
0x1737   : > { %v2858_v60 = vadd.f32 %v3307_v21, %v2857_v58  ;;  %v3582_v61 = vpop.f32.mrb[25].mxu0 }
0x1739   : > { %v2874_v1 = vmul.f32 0.70710677, %v2858_v60  ;;  %v2871_v0 = vmul.f32 0.5, %v2858_v60 }
0x173b   : > { %3950 = verf.f32 %v2874_v1 }
0x1745   : > { %v3951_v62 = vpop.eup %3950 }
0x1746   : > { %v2880_v2 = vadd.f32 1.0, %v3951_v62 }
0x1748   : > { %v2883_v3 = vmul.f32 %v2880_v2, %v2871_v0  ;;  %v3314_v0 = vld [vmem:[%s4728_s1] ss:$0 sm:$0xff] (!%p3313_p5) }
0x174a   : > { %3622 = vmatmul.mubr.f32.vlgmr.msra.gmra.mrb[20].mxu1 %v2883_v3  ;;  %v3315_v3 = vld [vmem:[%s4729_s5] ss:$0 sm:$0xff] (!%p3313_p5) }
0x174b   : > { %3624 = vmatprep.mubr.msk.f32.mxu1 %vm3974_vm4, %v3975_v30 }
0x17c2   : > { %v2862_v47 = vpop.f32.mrb[26].mxu0 }
0x17c3   : > { %v2863_v4 = vadd.f32 %v3307_v21, %v2862_v47  ;;  %v3585_v5 = vpop.f32.mrb[27].mxu0 }
0x17c5   : > { %v2875_v8 = vmul.f32 0.70710677, %v2863_v4  ;;  %v2872_v15 = vmul.f32 0.5, %v2863_v4 }
0x17c7   : > { %3952 = verf.f32 %v2875_v8  ;;  %v2867_v34 = vpop.f32.mrb[28].mxu0 }
0x17c8   : > { %v2868_v28 = vadd.f32 %v3307_v21, %v2867_v34  ;;  %v3588_v9 = vpop.f32.mrb[29].mxu0 }
0x17ca   : > { %v2876_v13 = vmul.f32 0.70710677, %v2868_v28  ;;  %v2873_v19 = vmul.f32 0.5, %v2868_v28 }
0x17cc   : > { %3954 = verf.f32 %v2876_v13 }
0x17d1   : > { %v3953_v14 = vpop.eup %3952 }
0x17d2   : > { %v2881_v16 = vadd.f32 1.0, %v3953_v14 }
0x17d4   : > { %v2884_v17 = vmul.f32 %v2881_v16, %v2872_v15 }
0x17d6   : > { %v3955_v18 = vpop.eup %3954  ;;  %3625 = vmatmul.mubr.f32.gmra.mrb[22].mxu1 %v2884_v17 }
0x17d7   : > { %v2882_v22 = vadd.f32 1.0, %v3955_v18  ;;  %3627 = vmatprep.mubr.msk.f32.mxu1 %vm3974_vm4, %v3975_v30 }
0x17d9   : > { %v2885_v23 = vmul.f32 %v2882_v22, %v2873_v19 }
0x17db   : > { %3628 = vmatmul.mubr.f32.gmra.mrb[24].mxu1 %v2885_v23 }
0x181d   : > { %v2975_v25 = vpop.f32.mrb[20].mxu1 }
0x181e   : > { %v2976_v27 = vadd.f32 %v3311_v24, %v2975_v25  ;;  %v3623_v31 = vpop.f32.mrb[21].mxu1 }
0x1820   : > { %v2996_v32 = vmul.f32 %v3312_v26, %v2976_v27 }
0x1822   : > { %v2999_v33 = vadd.f32 %v2996_v32, %v4521_v63 }
0x1824   : > { %3002 = vst.msk [vmem:[%s4697_s17] sm:$0xff] %vm751_vm2, %v2999_v33 }
0x18a9   : > { %v2980_v30 = vpop.f32.mrb[22].mxu1 }
0x18aa   : > { %v2981_v35 = vadd.f32 %v3311_v24, %v2980_v30  ;;  %v3626_v11 = vpop.f32.mrb[23].mxu1 }
0x18ac   : > { %v2997_v6 = vmul.f32 %v3312_v26, %v2981_v35 }
0x18ae   : > { %v3000_v36 = vadd.f32 %v2997_v6, %v4546_v43  ;;  %v2985_v46 = vpop.f32.mrb[24].mxu1  ;;  %v3011_v43 = vsel (!%p3313_p5), %vm751_vm2, %v2999_v33, 0.0 }
0x18af   : > { %v2986_v57 = vadd.f32 %v3311_v24, %v2985_v46  ;;  %v3629_v38 = vpop.f32.mrb[25].mxu1  ;;  %3008 = sbr.rel (%p3313_p5) target bundleno = 6640 (0x19f0), region = 96  ;;  %3012 = vadd.xlane.f32.xlu0 (!%p3313_p5), %v3011_v43 }
0x18b0   : > { %3003 = vst.msk [vmem:[%s4697_s17 + $0x8] sm:$0xff] %vm751_vm2, %v3000_v36  ;;  %v3014_v39 = vsel (!%p3313_p5), %vm751_vm2, %v3000_v36, 0.0 }
0x18b1   : > { %v2998_v63 = vmul.f32 %v3312_v26, %v2986_v57 }
0x18b3   : > { %v3001_v10 = vadd.f32 %v2998_v63, %v4554_v12  ;;  %3015 = vadd.xlane.f32.xlu0 (!%p3313_p5), %v3014_v39 }
0x18b5   : > { %3004 = vst.msk [vmem:[%s4697_s17 + $0x10] sm:$0x3] %vm758_vm3, %v3001_v10  ;;  %v3017_v59 = vsel (!%p3313_p5), %vm758_vm3, %v3001_v10, 0.0 }
0x18b6   : > { %3018 = vadd.xlane.f32.xlu1 %v3017_v59 }
0x193c   : > { %v3013_v40 = vpop.xlane.xlu0 %3012 }
0x193d   : > { %v3020_v12 = vmul.f32 0.03125, %v3013_v40 }
0x193f   : > { %v3023_v7 = vsub.f32 %v2999_v33, %v3020_v12 }
0x1940   : > { %v3016_v56 = vpop.xlane.xlu0 %3015 }
0x1941   : > { %v3021_v44 = vmul.f32 0.03125, %v3016_v56  ;;  %v3026_v45 = vmul.f32 %v3023_v7, %v3023_v7 }
0x1943   : > { %v3019_v41 = vpop.xlane.xlu1 %3018  ;;  %v3024_v49 = vsub.f32 %v3000_v36, %v3021_v44  ;;  %v3029_v37 = vsel %vm751_vm2, %v3026_v45, 0.0 }
0x1944   : > { %v3022_v42 = vmul.f32 0.03125, %v3019_v41  ;;  %3030 = vadd.xlane.f32.xlu1 %v3029_v37 }
0x1945   : > { %v3027_v51 = vmul.f32 %v3024_v49, %v3024_v49 }
0x1946   : > { %v3025_v20 = vsub.f32 %v3001_v10, %v3022_v42 }
0x1947   : > { %v3032_v52 = vsel %vm751_vm2, %v3027_v51, 0.0 }
0x1948   : > { %v3028_v48 = vmul.f32 %v3025_v20, %v3025_v20  ;;  %3033 = vadd.xlane.f32.xlu0 %v3032_v52 }
0x194a   : > { %v3035_v50 = vsel %vm758_vm3, %v3028_v48, 0.0 }
0x194b   : > { %3036 = vadd.xlane.f32.xlu1 %v3035_v50 }
0x19d1   : > { %v3031_v53 = vpop.xlane.xlu1 %3030 }
0x19d2   : > { %v3038_v29 = vmul.f32 0.03125, %v3031_v53 }
0x19d4   : > { %v3041_v54 = vadd.f32 1e-06, %v3038_v29 }
0x19d5   : > { %v3034_v21 = vpop.xlane.xlu0 %3033 }
0x19d6   : > { %3959 = vrsqrt.f32 %v3041_v54  ;;  %v3039_v60 = vmul.f32 0.03125, %v3034_v21 }
0x19d8   : > { %v3037_v55 = vpop.xlane.xlu1 %3036  ;;  %v3042_v1 = vadd.f32 1e-06, %v3039_v60 }
0x19d9   : > { %v3040_v58 = vmul.f32 0.03125, %v3037_v55 }
0x19db   : > { %v3043_v61 = vadd.f32 1e-06, %v3040_v58 }
0x19dd   : > { %3961 = vrsqrt.f32 %v3043_v61 }
0x19de   : > { %3963 = vrsqrt.f32 %v3042_v1 }
0x19e0   : > { %v3960_v62 = vpop.eup %3959 }
0x19e1   : > { %v3047_v2 = vmul.f32 %v3960_v62, %v3023_v7 }
0x19e3   : > { %v3056_v47 = vmul.f32 %v3314_v0, %v3047_v2 }
0x19e5   : > { %v3065_v8 = vadd.f32 %v3315_v3, %v3056_v47 }
0x19e7   : > { %v3962_v4 = vpop.eup %3961  ;;  %3068 = vst.msk [vmem:[%s4697_s17] sm:$0xff] %vm751_vm2, %v3065_v8 }
0x19e8   : > { %v3964_v5 = vpop.eup %3963  ;;  %v3049_v34 = vmul.f32 %v3962_v4, %v3025_v20 }
0x19e9   : > { %v3048_v28 = vmul.f32 %v3964_v5, %v3024_v49 }
0x19ea   : > { %v3058_v9 = vmul.f32 %v3314_v0, %v3049_v34 }
0x19eb   : > { %v3057_v13 = vmul.f32 %v3314_v0, %v3048_v28 }
0x19ec   : > { %v3067_v14 = vadd.f32 %v3315_v3, %v3058_v9 }
0x19ed   : > { %v3066_v15 = vadd.f32 %v3315_v3, %v3057_v13 }
0x19ee   : > { %3070 = vst.msk [vmem:[%s4697_s17 + $0x10] sm:$0x3] %vm758_vm3, %v3067_v14 }
0x19ef   : > { %3069 = vst.msk [vmem:[%s4697_s17 + $0x8] sm:$0xff] %vm751_vm2, %v3066_v15 }
0x19f0 PF: > { %s4730_s20 = sld [smem:[#allocation2_spill]] }
0x19f6   : > { %s27_s24 = sadd.s32 1, %s4730_s20  }
0x19f7   : > { %p24_p6 = scmp.ge.s32.totalorder %s27_s24, 12  }
0x19f9   :  { %26 = sbr.rel (!%p24_p6) target bundleno = 9 (0x9), region = 161 }

</bundles_post_ra>
